<compile_context>
chip_gen: v5e
topology: v5e:2x2
jax: 0.10.0
libtpu: 0.0.40
codegen_flags: <defaults>
</compile_context>

<pallas_src>
import functools

import jax
import jax.numpy as jnp
from jax.experimental import pallas as pl
from jax.experimental.pallas import tpu as pltpu

KSIZE = 7
PAD = 3


def sam_kernel(w_ref, b_ref, mask_ref, x_ref, o_ref, pad_ref, *, W, HW, LPAD):
    # x_ref/o_ref : (Nb, C, HW) lane-dense blocks
    # w_ref       : (2*7*7,) SMEM   conv weights, flattened [in_ch, ky, kx]
    # b_ref       : (1,)     SMEM   conv bias
    # mask_ref    : (7, 1, HW) VMEM per-dx column-validity masks (f32 0/1)
    # pad_ref     : (Nb, 2, LPAD + HW + S) f32 VMEM zero-bordered flat planes
    nb = x_ref.shape[0]
    PADW = pad_ref.shape[-1]

    # ---- Channel pooling: max in input dtype, mean with f32 accumulation ----
    xp = x_ref[...]                                         # (nb, C, HW)
    mx = jnp.max(xp, axis=1, keepdims=True).astype(jnp.float32)
    av = jnp.mean(xp.astype(jnp.float32), axis=1, keepdims=True)

    # ---- Zero-bordered flat planes; interior store is lane-aligned ----------
    # Only the halo borders are zeroed (the interior is overwritten every
    # step), and it is done every step so it is megacore-safe.
    pad_ref[:, :, :LPAD] = jnp.zeros((nb, 2, LPAD), jnp.float32)
    pad_ref[:, :, LPAD + HW:] = jnp.zeros((nb, 2, PADW - LPAD - HW), jnp.float32)
    pad_ref[:, 0:1, LPAD:LPAD + HW] = mx                    # aligned, unmasked
    pad_ref[:, 1:2, LPAD:LPAD + HW] = av
    padded = pad_ref[...]                                   # (nb, 2, PADW) f32
    maskx = mask_ref[...]                                   # (7, 1, HW) f32

    # ---- 7x7 conv (2 -> 1) as 49 static lane-shift taps + per-dx masks ------
    # Flat offset of tap (dy,dx) is (dy-3)*W + (dx-3); vertical out-of-range
    # falls into the zero borders, horizontal out-of-range is killed by the
    # per-dx column mask.
    acc = jnp.zeros((nb, 1, HW), jnp.float32)
    for dx in range(KSIZE):
        ox = dx - PAD
        part = None
        for dy in range(KSIZE):
            oy = dy - PAD
            start = LPAD + oy * W + ox                      # static offset
            win = padded[:, :, start:start + HW]            # (nb, 2, HW)
            t = (w_ref[dy * KSIZE + dx] * win[:, 0:1, :]
                 + w_ref[KSIZE * KSIZE + dy * KSIZE + dx] * win[:, 1:2, :])
            part = t if part is None else part + t
        acc = acc + maskx[dx:dx + 1, :, :] * part

    ms = jax.nn.sigmoid(acc + b_ref[0])                     # (nb, 1, HW) f32

    # ---- Gate: re-read x_ref here (no long-lived f32 copy of the block) -----
    o_ref[...] = (ms.astype(x_ref.dtype) * x_ref[...]).astype(o_ref.dtype)


def spatial_attention(x, w, b, *, max_block_bytes=8 << 20, min_grid_steps=4):
    """x: (N, C, H, W), w: (1, 2, 7, 7), b: (1,)."""
    N, C, H, W = x.shape
    HW = H * W
    S = PAD * W + PAD                       # max |flat tap offset|
    LPAD = ((S + 127) // 128) * 128         # lane-aligned left border >= S
    PADW = LPAD + HW + S

    x2 = x.reshape(N, C, HW)                                # lane-dense layout
    w_flat = w.reshape(-1).astype(jnp.float32)              # (2*49,)
    b_flat = b.reshape(-1).astype(jnp.float32)              # (1,)

    # Host-precomputed per-dx column-validity masks (no in-kernel mod/iota).
    col = jnp.arange(HW, dtype=jnp.int32) % W
    maskx = jnp.stack(
        [jnp.logical_and(col + (dx - PAD) >= 0, col + (dx - PAD) < W)
         for dx in range(KSIZE)], axis=0).astype(jnp.float32)
    maskx = maskx.reshape(KSIZE, 1, HW)

    itemsize = x.dtype.itemsize
    per_n_block = C * HW * itemsize

    # Physical VMEM of the local chip; conservative v7x fallback.
    try:
        phys_vmem = int(pltpu.get_tpu_info().vmem_capacity_bytes)
        if phys_vmem <= 0:
            phys_vmem = 64 << 20
    except Exception:
        phys_vmem = 64 << 20
    vmem_cap = min((phys_vmem * 3) // 4, 100 << 20)   # ~48 MiB v7x, ~96 MiB v5e/v6e

    def step_bytes(nb):
        blk = nb * per_n_block
        return (4 * blk                     # in + out blocks, double-buffered
                + nb * C * HW * 4           # transient f32 pooling temp
                + nb * 2 * PADW * 4         # flat conv scratch
                + 16 * nb * HW * 4          # small (nb,1,HW) temporaries
                + 2 * KSIZE * HW * 4)       # masks

    # Nb: keep at least `min_grid_steps` grid steps when N allows, and keep
    # the block under both the byte sweet-spot and the VMEM cap.
    nb = max(1, min(N, pl.cdiv(N, min_grid_steps)))
    while nb > 1 and (nb * per_n_block > max_block_bytes
                      or step_bytes(nb) > vmem_cap):
        nb -= 1
    Nb = nb
    grid = (pl.cdiv(N, Nb),)

    vmem_limit = int(min(vmem_cap, max(32 << 20, step_bytes(Nb) + (4 << 20))))

    cost = pl.CostEstimate(
        flops=int(3 * N * C * HW + N * HW * (4 * KSIZE * KSIZE + 8)),
        transcendentals=int(N * HW),
        bytes_accessed=int(2 * N * C * HW * itemsize))

    kernel = functools.partial(sam_kernel, W=W, HW=HW, LPAD=LPAD)

    out = pl.pallas_call(
        kernel,
        out_shape=jax.ShapeDtypeStruct((N, C, HW), x.dtype),
        grid=grid,
        in_specs=[
            pl.BlockSpec(memory_space=pltpu.MemorySpace.SMEM),     # weights
            pl.BlockSpec(memory_space=pltpu.MemorySpace.SMEM),     # bias
            pl.BlockSpec((KSIZE, 1, HW), lambda n: (0, 0, 0)),     # masks
            pl.BlockSpec((Nb, C, HW), lambda n: (n, 0, 0)),        # x
        ],
        out_specs=pl.BlockSpec((Nb, C, HW), lambda n: (n, 0, 0)),
        scratch_shapes=[pltpu.VMEM((Nb, 2, PADW), jnp.float32)],
        compiler_params=pltpu.CompilerParams(
            dimension_semantics=("parallel",),
            vmem_limit_bytes=vmem_limit),
        cost_estimate=cost,
    )(w_flat, b_flat, maskx, x2)
    return out.reshape(N, C, H, W)


def ref_forward(x, w, b):
    """Pure-JAX reference mirroring the PyTorch forward."""
    mx = jnp.max(x, axis=1, keepdims=True)
    av = jnp.mean(x, axis=1, keepdims=True)
    xcat = jnp.concatenate([mx, av], axis=1)
    out = jax.lax.conv_general_dilated(
        xcat, w, window_strides=(1, 1), padding=[(PAD, PAD), (PAD, PAD)],
        dimension_numbers=("NCHW", "OIHW", "NCHW")) + b.reshape(1, 1, 1, 1)
    return jax.nn.sigmoid(out) * x


if __name__ == "__main__":
    key = jax.random.PRNGKey(0)
    kx, kw, kb = jax.random.split(key, 3)

    # Small shapes consistent with the module: N=2, C=4, H=W=16.
    N, C, H, W = 2, 4, 16, 16
    x = jax.random.normal(kx, (N, C, H, W), dtype=jnp.float32)

    # Deterministic Conv2d(2, 1, 7) init (Kaiming-uniform-like bounds).
    fan_in = 2 * KSIZE * KSIZE
    bound = 1.0 / (fan_in ** 0.5)
    w = jax.random.uniform(kw, (1, 2, KSIZE, KSIZE), jnp.float32,
                           minval=-bound, maxval=bound)
    b = jax.random.uniform(kb, (1,), jnp.float32, minval=-bound, maxval=bound)

    out = jax.block_until_ready(spatial_attention(x, w, b))
    ref = ref_forward(x, w, b)
    assert out.shape == (N, C, H, W)
    assert jnp.allclose(out, ref, atol=1e-5, rtol=1e-5), \
        f"max abs err {jnp.max(jnp.abs(out - ref))}"

    # Multi-step pipelined grid: N=8 -> Nb=2 per step, 4 grid steps.
    N2 = 8
    xb = jax.random.normal(kx, (N2, C, H, W), dtype=jnp.float32)
    out2 = jax.block_until_ready(spatial_attention(xb, w, b))
    ref2 = ref_forward(xb, w, b)
    assert jnp.allclose(out2, ref2, atol=1e-5, rtol=1e-5), \
        f"max abs err {jnp.max(jnp.abs(out2 - ref2))}"

    print("KERNEL_OK")
</pallas_src>

<mosaic_0001>
module attributes {stable_mosaic.version = 11 : i64} {
  func.func @sam_kernel(%arg0: i32, %arg1: memref<98xf32, #tpu.memory_space<smem>>, %arg2: memref<1xf32, #tpu.memory_space<smem>>, %arg3: memref<7x1x256xf32, #tpu.memory_space<vmem>>, %arg4: memref<1x4x256xf32, #tpu.memory_space<vmem>>, %arg5: memref<1x4x256xf32, #tpu.memory_space<vmem>>, %arg6: memref<1x2x435xf32, #tpu.memory_space<vmem>>) attributes {dimension_semantics = [#tpu.dimension_semantics<parallel>], iteration_bounds = array<i64: 2>, scalar_prefetch = 0 : i64, scratch_operands = 1 : i64, tpu.core_type = #tpu.core_type<tc>, window_params = [{transform_indices = @transform_0, window_bounds = array<i64: 98>}, {transform_indices = @transform_1, window_bounds = array<i64: 1>}, {pipeline_mode = #tpu.pipeline_mode<synchronous>, transform_indices = @transform_2, window_bounds = array<i64: 7, 1, 256>}, {transform_indices = @transform_3, window_bounds = array<i64: 1, 4, 256>}, {transform_indices = @transform_4, window_bounds = array<i64: 1, 4, 256>}]} {
    %c0 = arith.constant 0 : index
    %c0_0 = arith.constant 0 : index
    %c0_1 = arith.constant 0 : index
    %0 = vector.load %arg4[%c0, %c0_0, %c0_1] : memref<1x4x256xf32, #tpu.memory_space<vmem>>, vector<1x4x256xf32>
    %cst = arith.constant dense<0xFF800000> : vector<1x256xf32>
    %1 = vector.multi_reduction <maximumf>, %0, %cst [1] : vector<1x4x256xf32> to vector<1x256xf32>
    %2 = vector.shape_cast %1 : vector<1x256xf32> to vector<1x1x256xf32>
    %cst_2 = arith.constant dense<0.000000e+00> : vector<1x256xf32>
    %3 = vector.multi_reduction <add>, %0, %cst_2 [1] : vector<1x4x256xf32> to vector<1x256xf32>
    %4 = vector.shape_cast %3 : vector<1x256xf32> to vector<1x1x256xf32>
    %cst_3 = arith.constant 4.000000e+00 : f32
    %5 = vector.broadcast %cst_3 : f32 to vector<1x1x256xf32>
    %6 = arith.divf %4, %5 : vector<1x1x256xf32>
    %cst_4 = arith.constant 0.000000e+00 : f32
    %7 = vector.broadcast %cst_4 : f32 to vector<1x2x128xf32>
    %c0_5 = arith.constant 0 : index
    %c0_6 = arith.constant 0 : index
    %c0_7 = arith.constant 0 : index
    %8 = vector.load %arg6[%c0_5, %c0_6, %c0_7] : memref<1x2x435xf32, #tpu.memory_space<vmem>>, vector<1x2x128xf32>
    tpu.vector_store %arg6[%c0_5, %c0_6, %c0_7], %7 {strides = array<i32>} : memref<1x2x435xf32, #tpu.memory_space<vmem>>, vector<1x2x128xf32>,
    %cst_8 = arith.constant 0.000000e+00 : f32
    %9 = vector.broadcast %cst_8 : f32 to vector<1x2x51xf32>
    %c0_9 = arith.constant 0 : index
    %c0_10 = arith.constant 0 : index
    %c384 = arith.constant 384 : index
    %10 = vector.load %arg6[%c0_9, %c0_10, %c384] : memref<1x2x435xf32, #tpu.memory_space<vmem>>, vector<1x2x51xf32>
    tpu.vector_store %arg6[%c0_9, %c0_10, %c384], %9 {strides = array<i32>} : memref<1x2x435xf32, #tpu.memory_space<vmem>>, vector<1x2x51xf32>,
    %c0_11 = arith.constant 0 : index
    %c0_12 = arith.constant 0 : index
    %c128 = arith.constant 128 : index
    %11 = vector.load %arg6[%c0_11, %c0_12, %c128] : memref<1x2x435xf32, #tpu.memory_space<vmem>>, vector<1x1x256xf32>
    tpu.vector_store %arg6[%c0_11, %c0_12, %c128], %2 {strides = array<i32>} : memref<1x2x435xf32, #tpu.memory_space<vmem>>, vector<1x1x256xf32>,
    %c0_13 = arith.constant 0 : index
    %c1 = arith.constant 1 : index
    %c128_14 = arith.constant 128 : index
    %12 = vector.load %arg6[%c0_13, %c1, %c128_14] : memref<1x2x435xf32, #tpu.memory_space<vmem>>, vector<1x1x256xf32>
    tpu.vector_store %arg6[%c0_13, %c1, %c128_14], %6 {strides = array<i32>} : memref<1x2x435xf32, #tpu.memory_space<vmem>>, vector<1x1x256xf32>,
    %c0_15 = arith.constant 0 : index
    %c0_16 = arith.constant 0 : index
    %c0_17 = arith.constant 0 : index
    %13 = vector.load %arg6[%c0_15, %c0_16, %c0_17] : memref<1x2x435xf32, #tpu.memory_space<vmem>>, vector<1x2x435xf32>
    %c0_18 = arith.constant 0 : index
    %c0_19 = arith.constant 0 : index
    %c0_20 = arith.constant 0 : index
    %14 = vector.load %arg3[%c0_18, %c0_19, %c0_20] : memref<7x1x256xf32, #tpu.memory_space<vmem>>, vector<7x1x256xf32>
    %cst_21 = arith.constant 0.000000e+00 : f32
    %15 = vector.broadcast %cst_21 : f32 to vector<1x1x256xf32>
    %16 = vector.extract_strided_slice %13 {offsets = [0, 0, 77], sizes = [1, 2, 256], strides = [1, 1, 1]} : vector<1x2x435xf32> to vector<1x2x256xf32>
    %c0_22 = arith.constant 0 : index
    %17 = memref.load %arg1[%c0_22] : memref<98xf32, #tpu.memory_space<smem>>
    %18 = vector.extract_strided_slice %16 {offsets = [0, 0, 0], sizes = [1, 1, 256], strides = [1, 1, 1]} : vector<1x2x256xf32> to vector<1x1x256xf32>
    %19 = vector.broadcast %17 : f32 to vector<1x1x256xf32>
    %20 = arith.mulf %19, %18 : vector<1x1x256xf32>
    %c49 = arith.constant 49 : index
    %21 = memref.load %arg1[%c49] : memref<98xf32, #tpu.memory_space<smem>>
    %22 = vector.extract_strided_slice %16 {offsets = [0, 1, 0], sizes = [1, 1, 256], strides = [1, 1, 1]} : vector<1x2x256xf32> to vector<1x1x256xf32>
    %23 = vector.broadcast %21 : f32 to vector<1x1x256xf32>
    %24 = arith.mulf %23, %22 : vector<1x1x256xf32>
    %25 = arith.addf %20, %24 : vector<1x1x256xf32>
    %26 = vector.extract_strided_slice %13 {offsets = [0, 0, 93], sizes = [1, 2, 256], strides = [1, 1, 1]} : vector<1x2x435xf32> to vector<1x2x256xf32>
    %c7 = arith.constant 7 : index
    %27 = memref.load %arg1[%c7] : memref<98xf32, #tpu.memory_space<smem>>
    %28 = vector.extract_strided_slice %26 {offsets = [0, 0, 0], sizes = [1, 1, 256], strides = [1, 1, 1]} : vector<1x2x256xf32> to vector<1x1x256xf32>
    %29 = vector.broadcast %27 : f32 to vector<1x1x256xf32>
    %30 = arith.mulf %29, %28 : vector<1x1x256xf32>
    %c56 = arith.constant 56 : index
    %31 = memref.load %arg1[%c56] : memref<98xf32, #tpu.memory_space<smem>>
    %32 = vector.extract_strided_slice %26 {offsets = [0, 1, 0], sizes = [1, 1, 256], strides = [1, 1, 1]} : vector<1x2x256xf32> to vector<1x1x256xf32>
    %33 = vector.broadcast %31 : f32 to vector<1x1x256xf32>
    %34 = arith.mulf %33, %32 : vector<1x1x256xf32>
    %35 = arith.addf %30, %34 : vector<1x1x256xf32>
    %36 = arith.addf %25, %35 : vector<1x1x256xf32>
    %37 = vector.extract_strided_slice %13 {offsets = [0, 0, 109], sizes = [1, 2, 256], strides = [1, 1, 1]} : vector<1x2x435xf32> to vector<1x2x256xf32>
    %c14 = arith.constant 14 : index
    %38 = memref.load %arg1[%c14] : memref<98xf32, #tpu.memory_space<smem>>
    %39 = vector.extract_strided_slice %37 {offsets = [0, 0, 0], sizes = [1, 1, 256], strides = [1, 1, 1]} : vector<1x2x256xf32> to vector<1x1x256xf32>
    %40 = vector.broadcast %38 : f32 to vector<1x1x256xf32>
    %41 = arith.mulf %40, %39 : vector<1x1x256xf32>
    %c63 = arith.constant 63 : index
    %42 = memref.load %arg1[%c63] : memref<98xf32, #tpu.memory_space<smem>>
    %43 = vector.extract_strided_slice %37 {offsets = [0, 1, 0], sizes = [1, 1, 256], strides = [1, 1, 1]} : vector<1x2x256xf32> to vector<1x1x256xf32>
    %44 = vector.broadcast %42 : f32 to vector<1x1x256xf32>
    %45 = arith.mulf %44, %43 : vector<1x1x256xf32>
    %46 = arith.addf %41, %45 : vector<1x1x256xf32>
    %47 = arith.addf %36, %46 : vector<1x1x256xf32>
    %48 = vector.extract_strided_slice %13 {offsets = [0, 0, 125], sizes = [1, 2, 256], strides = [1, 1, 1]} : vector<1x2x435xf32> to vector<1x2x256xf32>
    %c21 = arith.constant 21 : index
    %49 = memref.load %arg1[%c21] : memref<98xf32, #tpu.memory_space<smem>>
    %50 = vector.extract_strided_slice %48 {offsets = [0, 0, 0], sizes = [1, 1, 256], strides = [1, 1, 1]} : vector<1x2x256xf32> to vector<1x1x256xf32>
    %51 = vector.broadcast %49 : f32 to vector<1x1x256xf32>
    %52 = arith.mulf %51, %50 : vector<1x1x256xf32>
    %c70 = arith.constant 70 : index
    %53 = memref.load %arg1[%c70] : memref<98xf32, #tpu.memory_space<smem>>
    %54 = vector.extract_strided_slice %48 {offsets = [0, 1, 0], sizes = [1, 1, 256], strides = [1, 1, 1]} : vector<1x2x256xf32> to vector<1x1x256xf32>
    %55 = vector.broadcast %53 : f32 to vector<1x1x256xf32>
    %56 = arith.mulf %55, %54 : vector<1x1x256xf32>
    %57 = arith.addf %52, %56 : vector<1x1x256xf32>
    %58 = arith.addf %47, %57 : vector<1x1x256xf32>
    %59 = vector.extract_strided_slice %13 {offsets = [0, 0, 141], sizes = [1, 2, 256], strides = [1, 1, 1]} : vector<1x2x435xf32> to vector<1x2x256xf32>
    %c28 = arith.constant 28 : index
    %60 = memref.load %arg1[%c28] : memref<98xf32, #tpu.memory_space<smem>>
    %61 = vector.extract_strided_slice %59 {offsets = [0, 0, 0], sizes = [1, 1, 256], strides = [1, 1, 1]} : vector<1x2x256xf32> to vector<1x1x256xf32>
    %62 = vector.broadcast %60 : f32 to vector<1x1x256xf32>
    %63 = arith.mulf %62, %61 : vector<1x1x256xf32>
    %c77 = arith.constant 77 : index
    %64 = memref.load %arg1[%c77] : memref<98xf32, #tpu.memory_space<smem>>
    %65 = vector.extract_strided_slice %59 {offsets = [0, 1, 0], sizes = [1, 1, 256], strides = [1, 1, 1]} : vector<1x2x256xf32> to vector<1x1x256xf32>
    %66 = vector.broadcast %64 : f32 to vector<1x1x256xf32>
    %67 = arith.mulf %66, %65 : vector<1x1x256xf32>
    %68 = arith.addf %63, %67 : vector<1x1x256xf32>
    %69 = arith.addf %58, %68 : vector<1x1x256xf32>
    %70 = vector.extract_strided_slice %13 {offsets = [0, 0, 157], sizes = [1, 2, 256], strides = [1, 1, 1]} : vector<1x2x435xf32> to vector<1x2x256xf32>
    %c35 = arith.constant 35 : index
    %71 = memref.load %arg1[%c35] : memref<98xf32, #tpu.memory_space<smem>>
    %72 = vector.extract_strided_slice %70 {offsets = [0, 0, 0], sizes = [1, 1, 256], strides = [1, 1, 1]} : vector<1x2x256xf32> to vector<1x1x256xf32>
    %73 = vector.broadcast %71 : f32 to vector<1x1x256xf32>
    %74 = arith.mulf %73, %72 : vector<1x1x256xf32>
    %c84 = arith.constant 84 : index
    %75 = memref.load %arg1[%c84] : memref<98xf32, #tpu.memory_space<smem>>
    %76 = vector.extract_strided_slice %70 {offsets = [0, 1, 0], sizes = [1, 1, 256], strides = [1, 1, 1]} : vector<1x2x256xf32> to vector<1x1x256xf32>
    %77 = vector.broadcast %75 : f32 to vector<1x1x256xf32>
    %78 = arith.mulf %77, %76 : vector<1x1x256xf32>
    %79 = arith.addf %74, %78 : vector<1x1x256xf32>
    %80 = arith.addf %69, %79 : vector<1x1x256xf32>
    %81 = vector.extract_strided_slice %13 {offsets = [0, 0, 173], sizes = [1, 2, 256], strides = [1, 1, 1]} : vector<1x2x435xf32> to vector<1x2x256xf32>
    %c42 = arith.constant 42 : index
    %82 = memref.load %arg1[%c42] : memref<98xf32, #tpu.memory_space<smem>>
    %83 = vector.extract_strided_slice %81 {offsets = [0, 0, 0], sizes = [1, 1, 256], strides = [1, 1, 1]} : vector<1x2x256xf32> to vector<1x1x256xf32>
    %84 = vector.broadcast %82 : f32 to vector<1x1x256xf32>
    %85 = arith.mulf %84, %83 : vector<1x1x256xf32>
    %c91 = arith.constant 91 : index
    %86 = memref.load %arg1[%c91] : memref<98xf32, #tpu.memory_space<smem>>
    %87 = vector.extract_strided_slice %81 {offsets = [0, 1, 0], sizes = [1, 1, 256], strides = [1, 1, 1]} : vector<1x2x256xf32> to vector<1x1x256xf32>
    %88 = vector.broadcast %86 : f32 to vector<1x1x256xf32>
    %89 = arith.mulf %88, %87 : vector<1x1x256xf32>
    %90 = arith.addf %85, %89 : vector<1x1x256xf32>
    %91 = arith.addf %80, %90 : vector<1x1x256xf32>
    %92 = vector.extract_strided_slice %14 {offsets = [0, 0, 0], sizes = [1, 1, 256], strides = [1, 1, 1]} : vector<7x1x256xf32> to vector<1x1x256xf32>
    %93 = arith.mulf %92, %91 : vector<1x1x256xf32>
    %94 = arith.addf %15, %93 : vector<1x1x256xf32>
    %95 = vector.extract_strided_slice %13 {offsets = [0, 0, 78], sizes = [1, 2, 256], strides = [1, 1, 1]} : vector<1x2x435xf32> to vector<1x2x256xf32>
    %c1_23 = arith.constant 1 : index
    %96 = memref.load %arg1[%c1_23] : memref<98xf32, #tpu.memory_space<smem>>
    %97 = vector.extract_strided_slice %95 {offsets = [0, 0, 0], sizes = [1, 1, 256], strides = [1, 1, 1]} : vector<1x2x256xf32> to vector<1x1x256xf32>
    %98 = vector.broadcast %96 : f32 to vector<1x1x256xf32>
    %99 = arith.mulf %98, %97 : vector<1x1x256xf32>
    %c50 = arith.constant 50 : index
    %100 = memref.load %arg1[%c50] : memref<98xf32, #tpu.memory_space<smem>>
    %101 = vector.extract_strided_slice %95 {offsets = [0, 1, 0], sizes = [1, 1, 256], strides = [1, 1, 1]} : vector<1x2x256xf32> to vector<1x1x256xf32>
    %102 = vector.broadcast %100 : f32 to vector<1x1x256xf32>
    %103 = arith.mulf %102, %101 : vector<1x1x256xf32>
    %104 = arith.addf %99, %103 : vector<1x1x256xf32>
    %105 = vector.extract_strided_slice %13 {offsets = [0, 0, 94], sizes = [1, 2, 256], strides = [1, 1, 1]} : vector<1x2x435xf32> to vector<1x2x256xf32>
    %c8 = arith.constant 8 : index
    %106 = memref.load %arg1[%c8] : memref<98xf32, #tpu.memory_space<smem>>
    %107 = vector.extract_strided_slice %105 {offsets = [0, 0, 0], sizes = [1, 1, 256], strides = [1, 1, 1]} : vector<1x2x256xf32> to vector<1x1x256xf32>
    %108 = vector.broadcast %106 : f32 to vector<1x1x256xf32>
    %109 = arith.mulf %108, %107 : vector<1x1x256xf32>
    %c57 = arith.constant 57 : index
    %110 = memref.load %arg1[%c57] : memref<98xf32, #tpu.memory_space<smem>>
    %111 = vector.extract_strided_slice %105 {offsets = [0, 1, 0], sizes = [1, 1, 256], strides = [1, 1, 1]} : vector<1x2x256xf32> to vector<1x1x256xf32>
    %112 = vector.broadcast %110 : f32 to vector<1x1x256xf32>
    %113 = arith.mulf %112, %111 : vector<1x1x256xf32>
    %114 = arith.addf %109, %113 : vector<1x1x256xf32>
    %115 = arith.addf %104, %114 : vector<1x1x256xf32>
    %116 = vector.extract_strided_slice %13 {offsets = [0, 0, 110], sizes = [1, 2, 256], strides = [1, 1, 1]} : vector<1x2x435xf32> to vector<1x2x256xf32>
    %c15 = arith.constant 15 : index
    %117 = memref.load %arg1[%c15] : memref<98xf32, #tpu.memory_space<smem>>
    %118 = vector.extract_strided_slice %116 {offsets = [0, 0, 0], sizes = [1, 1, 256], strides = [1, 1, 1]} : vector<1x2x256xf32> to vector<1x1x256xf32>
    %119 = vector.broadcast %117 : f32 to vector<1x1x256xf32>
    %120 = arith.mulf %119, %118 : vector<1x1x256xf32>
    %c64 = arith.constant 64 : index
    %121 = memref.load %arg1[%c64] : memref<98xf32, #tpu.memory_space<smem>>
    %122 = vector.extract_strided_slice %116 {offsets = [0, 1, 0], sizes = [1, 1, 256], strides = [1, 1, 1]} : vector<1x2x256xf32> to vector<1x1x256xf32>
    %123 = vector.broadcast %121 : f32 to vector<1x1x256xf32>
    %124 = arith.mulf %123, %122 : vector<1x1x256xf32>
    %125 = arith.addf %120, %124 : vector<1x1x256xf32>
    %126 = arith.addf %115, %125 : vector<1x1x256xf32>
    %127 = vector.extract_strided_slice %13 {offsets = [0, 0, 126], sizes = [1, 2, 256], strides = [1, 1, 1]} : vector<1x2x435xf32> to vector<1x2x256xf32>
    %c22 = arith.constant 22 : index
    %128 = memref.load %arg1[%c22] : memref<98xf32, #tpu.memory_space<smem>>
    %129 = vector.extract_strided_slice %127 {offsets = [0, 0, 0], sizes = [1, 1, 256], strides = [1, 1, 1]} : vector<1x2x256xf32> to vector<1x1x256xf32>
    %130 = vector.broadcast %128 : f32 to vector<1x1x256xf32>
    %131 = arith.mulf %130, %129 : vector<1x1x256xf32>
    %c71 = arith.constant 71 : index
    %132 = memref.load %arg1[%c71] : memref<98xf32, #tpu.memory_space<smem>>
    %133 = vector.extract_strided_slice %127 {offsets = [0, 1, 0], sizes = [1, 1, 256], strides = [1, 1, 1]} : vector<1x2x256xf32> to vector<1x1x256xf32>
    %134 = vector.broadcast %132 : f32 to vector<1x1x256xf32>
    %135 = arith.mulf %134, %133 : vector<1x1x256xf32>
    %136 = arith.addf %131, %135 : vector<1x1x256xf32>
    %137 = arith.addf %126, %136 : vector<1x1x256xf32>
    %138 = vector.extract_strided_slice %13 {offsets = [0, 0, 142], sizes = [1, 2, 256], strides = [1, 1, 1]} : vector<1x2x435xf32> to vector<1x2x256xf32>
    %c29 = arith.constant 29 : index
    %139 = memref.load %arg1[%c29] : memref<98xf32, #tpu.memory_space<smem>>
    %140 = vector.extract_strided_slice %138 {offsets = [0, 0, 0], sizes = [1, 1, 256], strides = [1, 1, 1]} : vector<1x2x256xf32> to vector<1x1x256xf32>
    %141 = vector.broadcast %139 : f32 to vector<1x1x256xf32>
    %142 = arith.mulf %141, %140 : vector<1x1x256xf32>
    %c78 = arith.constant 78 : index
    %143 = memref.load %arg1[%c78] : memref<98xf32, #tpu.memory_space<smem>>
    %144 = vector.extract_strided_slice %138 {offsets = [0, 1, 0], sizes = [1, 1, 256], strides = [1, 1, 1]} : vector<1x2x256xf32> to vector<1x1x256xf32>
    %145 = vector.broadcast %143 : f32 to vector<1x1x256xf32>
    %146 = arith.mulf %145, %144 : vector<1x1x256xf32>
    %147 = arith.addf %142, %146 : vector<1x1x256xf32>
    %148 = arith.addf %137, %147 : vector<1x1x256xf32>
    %149 = vector.extract_strided_slice %13 {offsets = [0, 0, 158], sizes = [1, 2, 256], strides = [1, 1, 1]} : vector<1x2x435xf32> to vector<1x2x256xf32>
    %c36 = arith.constant 36 : index
    %150 = memref.load %arg1[%c36] : memref<98xf32, #tpu.memory_space<smem>>
    %151 = vector.extract_strided_slice %149 {offsets = [0, 0, 0], sizes = [1, 1, 256], strides = [1, 1, 1]} : vector<1x2x256xf32> to vector<1x1x256xf32>
    %152 = vector.broadcast %150 : f32 to vector<1x1x256xf32>
    %153 = arith.mulf %152, %151 : vector<1x1x256xf32>
    %c85 = arith.constant 85 : index
    %154 = memref.load %arg1[%c85] : memref<98xf32, #tpu.memory_space<smem>>
    %155 = vector.extract_strided_slice %149 {offsets = [0, 1, 0], sizes = [1, 1, 256], strides = [1, 1, 1]} : vector<1x2x256xf32> to vector<1x1x256xf32>
    %156 = vector.broadcast %154 : f32 to vector<1x1x256xf32>
    %157 = arith.mulf %156, %155 : vector<1x1x256xf32>
    %158 = arith.addf %153, %157 : vector<1x1x256xf32>
    %159 = arith.addf %148, %158 : vector<1x1x256xf32>
    %160 = vector.extract_strided_slice %13 {offsets = [0, 0, 174], sizes = [1, 2, 256], strides = [1, 1, 1]} : vector<1x2x435xf32> to vector<1x2x256xf32>
    %c43 = arith.constant 43 : index
    %161 = memref.load %arg1[%c43] : memref<98xf32, #tpu.memory_space<smem>>
    %162 = vector.extract_strided_slice %160 {offsets = [0, 0, 0], sizes = [1, 1, 256], strides = [1, 1, 1]} : vector<1x2x256xf32> to vector<1x1x256xf32>
    %163 = vector.broadcast %161 : f32 to vector<1x1x256xf32>
    %164 = arith.mulf %163, %162 : vector<1x1x256xf32>
    %c92 = arith.constant 92 : index
    %165 = memref.load %arg1[%c92] : memref<98xf32, #tpu.memory_space<smem>>
    %166 = vector.extract_strided_slice %160 {offsets = [0, 1, 0], sizes = [1, 1, 256], strides = [1, 1, 1]} : vector<1x2x256xf32> to vector<1x1x256xf32>
    %167 = vector.broadcast %165 : f32 to vector<1x1x256xf32>
    %168 = arith.mulf %167, %166 : vector<1x1x256xf32>
    %169 = arith.addf %164, %168 : vector<1x1x256xf32>
    %170 = arith.addf %159, %169 : vector<1x1x256xf32>
    %171 = vector.extract_strided_slice %14 {offsets = [1, 0, 0], sizes = [1, 1, 256], strides = [1, 1, 1]} : vector<7x1x256xf32> to vector<1x1x256xf32>
    %172 = arith.mulf %171, %170 : vector<1x1x256xf32>
    %173 = arith.addf %94, %172 : vector<1x1x256xf32>
    %174 = vector.extract_strided_slice %13 {offsets = [0, 0, 79], sizes = [1, 2, 256], strides = [1, 1, 1]} : vector<1x2x435xf32> to vector<1x2x256xf32>
    %c2 = arith.constant 2 : index
    %175 = memref.load %arg1[%c2] : memref<98xf32, #tpu.memory_space<smem>>
    %176 = vector.extract_strided_slice %174 {offsets = [0, 0, 0], sizes = [1, 1, 256], strides = [1, 1, 1]} : vector<1x2x256xf32> to vector<1x1x256xf32>
    %177 = vector.broadcast %175 : f32 to vector<1x1x256xf32>
    %178 = arith.mulf %177, %176 : vector<1x1x256xf32>
    %c51 = arith.constant 51 : index
    %179 = memref.load %arg1[%c51] : memref<98xf32, #tpu.memory_space<smem>>
    %180 = vector.extract_strided_slice %174 {offsets = [0, 1, 0], sizes = [1, 1, 256], strides = [1, 1, 1]} : vector<1x2x256xf32> to vector<1x1x256xf32>
    %181 = vector.broadcast %179 : f32 to vector<1x1x256xf32>
    %182 = arith.mulf %181, %180 : vector<1x1x256xf32>
    %183 = arith.addf %178, %182 : vector<1x1x256xf32>
    %184 = vector.extract_strided_slice %13 {offsets = [0, 0, 95], sizes = [1, 2, 256], strides = [1, 1, 1]} : vector<1x2x435xf32> to vector<1x2x256xf32>
    %c9 = arith.constant 9 : index
    %185 = memref.load %arg1[%c9] : memref<98xf32, #tpu.memory_space<smem>>
    %186 = vector.extract_strided_slice %184 {offsets = [0, 0, 0], sizes = [1, 1, 256], strides = [1, 1, 1]} : vector<1x2x256xf32> to vector<1x1x256xf32>
    %187 = vector.broadcast %185 : f32 to vector<1x1x256xf32>
    %188 = arith.mulf %187, %186 : vector<1x1x256xf32>
    %c58 = arith.constant 58 : index
    %189 = memref.load %arg1[%c58] : memref<98xf32, #tpu.memory_space<smem>>
    %190 = vector.extract_strided_slice %184 {offsets = [0, 1, 0], sizes = [1, 1, 256], strides = [1, 1, 1]} : vector<1x2x256xf32> to vector<1x1x256xf32>
    %191 = vector.broadcast %189 : f32 to vector<1x1x256xf32>
    %192 = arith.mulf %191, %190 : vector<1x1x256xf32>
    %193 = arith.addf %188, %192 : vector<1x1x256xf32>
    %194 = arith.addf %183, %193 : vector<1x1x256xf32>
    %195 = vector.extract_strided_slice %13 {offsets = [0, 0, 111], sizes = [1, 2, 256], strides = [1, 1, 1]} : vector<1x2x435xf32> to vector<1x2x256xf32>
    %c16 = arith.constant 16 : index
    %196 = memref.load %arg1[%c16] : memref<98xf32, #tpu.memory_space<smem>>
    %197 = vector.extract_strided_slice %195 {offsets = [0, 0, 0], sizes = [1, 1, 256], strides = [1, 1, 1]} : vector<1x2x256xf32> to vector<1x1x256xf32>
    %198 = vector.broadcast %196 : f32 to vector<1x1x256xf32>
    %199 = arith.mulf %198, %197 : vector<1x1x256xf32>
    %c65 = arith.constant 65 : index
    %200 = memref.load %arg1[%c65] : memref<98xf32, #tpu.memory_space<smem>>
    %201 = vector.extract_strided_slice %195 {offsets = [0, 1, 0], sizes = [1, 1, 256], strides = [1, 1, 1]} : vector<1x2x256xf32> to vector<1x1x256xf32>
    %202 = vector.broadcast %200 : f32 to vector<1x1x256xf32>
    %203 = arith.mulf %202, %201 : vector<1x1x256xf32>
    %204 = arith.addf %199, %203 : vector<1x1x256xf32>
    %205 = arith.addf %194, %204 : vector<1x1x256xf32>
    %206 = vector.extract_strided_slice %13 {offsets = [0, 0, 127], sizes = [1, 2, 256], strides = [1, 1, 1]} : vector<1x2x435xf32> to vector<1x2x256xf32>
    %c23 = arith.constant 23 : index
    %207 = memref.load %arg1[%c23] : memref<98xf32, #tpu.memory_space<smem>>
    %208 = vector.extract_strided_slice %206 {offsets = [0, 0, 0], sizes = [1, 1, 256], strides = [1, 1, 1]} : vector<1x2x256xf32> to vector<1x1x256xf32>
    %209 = vector.broadcast %207 : f32 to vector<1x1x256xf32>
    %210 = arith.mulf %209, %208 : vector<1x1x256xf32>
    %c72 = arith.constant 72 : index
    %211 = memref.load %arg1[%c72] : memref<98xf32, #tpu.memory_space<smem>>
    %212 = vector.extract_strided_slice %206 {offsets = [0, 1, 0], sizes = [1, 1, 256], strides = [1, 1, 1]} : vector<1x2x256xf32> to vector<1x1x256xf32>
    %213 = vector.broadcast %211 : f32 to vector<1x1x256xf32>
    %214 = arith.mulf %213, %212 : vector<1x1x256xf32>
    %215 = arith.addf %210, %214 : vector<1x1x256xf32>
    %216 = arith.addf %205, %215 : vector<1x1x256xf32>
    %217 = vector.extract_strided_slice %13 {offsets = [0, 0, 143], sizes = [1, 2, 256], strides = [1, 1, 1]} : vector<1x2x435xf32> to vector<1x2x256xf32>
    %c30 = arith.constant 30 : index
    %218 = memref.load %arg1[%c30] : memref<98xf32, #tpu.memory_space<smem>>
    %219 = vector.extract_strided_slice %217 {offsets = [0, 0, 0], sizes = [1, 1, 256], strides = [1, 1, 1]} : vector<1x2x256xf32> to vector<1x1x256xf32>
    %220 = vector.broadcast %218 : f32 to vector<1x1x256xf32>
    %221 = arith.mulf %220, %219 : vector<1x1x256xf32>
    %c79 = arith.constant 79 : index
    %222 = memref.load %arg1[%c79] : memref<98xf32, #tpu.memory_space<smem>>
    %223 = vector.extract_strided_slice %217 {offsets = [0, 1, 0], sizes = [1, 1, 256], strides = [1, 1, 1]} : vector<1x2x256xf32> to vector<1x1x256xf32>
    %224 = vector.broadcast %222 : f32 to vector<1x1x256xf32>
    %225 = arith.mulf %224, %223 : vector<1x1x256xf32>
    %226 = arith.addf %221, %225 : vector<1x1x256xf32>
    %227 = arith.addf %216, %226 : vector<1x1x256xf32>
    %228 = vector.extract_strided_slice %13 {offsets = [0, 0, 159], sizes = [1, 2, 256], strides = [1, 1, 1]} : vector<1x2x435xf32> to vector<1x2x256xf32>
    %c37 = arith.constant 37 : index
    %229 = memref.load %arg1[%c37] : memref<98xf32, #tpu.memory_space<smem>>
    %230 = vector.extract_strided_slice %228 {offsets = [0, 0, 0], sizes = [1, 1, 256], strides = [1, 1, 1]} : vector<1x2x256xf32> to vector<1x1x256xf32>
    %231 = vector.broadcast %229 : f32 to vector<1x1x256xf32>
    %232 = arith.mulf %231, %230 : vector<1x1x256xf32>
    %c86 = arith.constant 86 : index
    %233 = memref.load %arg1[%c86] : memref<98xf32, #tpu.memory_space<smem>>
    %234 = vector.extract_strided_slice %228 {offsets = [0, 1, 0], sizes = [1, 1, 256], strides = [1, 1, 1]} : vector<1x2x256xf32> to vector<1x1x256xf32>
    %235 = vector.broadcast %233 : f32 to vector<1x1x256xf32>
    %236 = arith.mulf %235, %234 : vector<1x1x256xf32>
    %237 = arith.addf %232, %236 : vector<1x1x256xf32>
    %238 = arith.addf %227, %237 : vector<1x1x256xf32>
    %239 = vector.extract_strided_slice %13 {offsets = [0, 0, 175], sizes = [1, 2, 256], strides = [1, 1, 1]} : vector<1x2x435xf32> to vector<1x2x256xf32>
    %c44 = arith.constant 44 : index
    %240 = memref.load %arg1[%c44] : memref<98xf32, #tpu.memory_space<smem>>
    %241 = vector.extract_strided_slice %239 {offsets = [0, 0, 0], sizes = [1, 1, 256], strides = [1, 1, 1]} : vector<1x2x256xf32> to vector<1x1x256xf32>
    %242 = vector.broadcast %240 : f32 to vector<1x1x256xf32>
    %243 = arith.mulf %242, %241 : vector<1x1x256xf32>
    %c93 = arith.constant 93 : index
    %244 = memref.load %arg1[%c93] : memref<98xf32, #tpu.memory_space<smem>>
    %245 = vector.extract_strided_slice %239 {offsets = [0, 1, 0], sizes = [1, 1, 256], strides = [1, 1, 1]} : vector<1x2x256xf32> to vector<1x1x256xf32>
    %246 = vector.broadcast %244 : f32 to vector<1x1x256xf32>
    %247 = arith.mulf %246, %245 : vector<1x1x256xf32>
    %248 = arith.addf %243, %247 : vector<1x1x256xf32>
    %249 = arith.addf %238, %248 : vector<1x1x256xf32>
    %250 = vector.extract_strided_slice %14 {offsets = [2, 0, 0], sizes = [1, 1, 256], strides = [1, 1, 1]} : vector<7x1x256xf32> to vector<1x1x256xf32>
    %251 = arith.mulf %250, %249 : vector<1x1x256xf32>
    %252 = arith.addf %173, %251 : vector<1x1x256xf32>
    %253 = vector.extract_strided_slice %13 {offsets = [0, 0, 80], sizes = [1, 2, 256], strides = [1, 1, 1]} : vector<1x2x435xf32> to vector<1x2x256xf32>
    %c3 = arith.constant 3 : index
    %254 = memref.load %arg1[%c3] : memref<98xf32, #tpu.memory_space<smem>>
    %255 = vector.extract_strided_slice %253 {offsets = [0, 0, 0], sizes = [1, 1, 256], strides = [1, 1, 1]} : vector<1x2x256xf32> to vector<1x1x256xf32>
    %256 = vector.broadcast %254 : f32 to vector<1x1x256xf32>
    %257 = arith.mulf %256, %255 : vector<1x1x256xf32>
    %c52 = arith.constant 52 : index
    %258 = memref.load %arg1[%c52] : memref<98xf32, #tpu.memory_space<smem>>
    %259 = vector.extract_strided_slice %253 {offsets = [0, 1, 0], sizes = [1, 1, 256], strides = [1, 1, 1]} : vector<1x2x256xf32> to vector<1x1x256xf32>
    %260 = vector.broadcast %258 : f32 to vector<1x1x256xf32>
    %261 = arith.mulf %260, %259 : vector<1x1x256xf32>
    %262 = arith.addf %257, %261 : vector<1x1x256xf32>
    %263 = vector.extract_strided_slice %13 {offsets = [0, 0, 96], sizes = [1, 2, 256], strides = [1, 1, 1]} : vector<1x2x435xf32> to vector<1x2x256xf32>
    %c10 = arith.constant 10 : index
    %264 = memref.load %arg1[%c10] : memref<98xf32, #tpu.memory_space<smem>>
    %265 = vector.extract_strided_slice %263 {offsets = [0, 0, 0], sizes = [1, 1, 256], strides = [1, 1, 1]} : vector<1x2x256xf32> to vector<1x1x256xf32>
    %266 = vector.broadcast %264 : f32 to vector<1x1x256xf32>
    %267 = arith.mulf %266, %265 : vector<1x1x256xf32>
    %c59 = arith.constant 59 : index
    %268 = memref.load %arg1[%c59] : memref<98xf32, #tpu.memory_space<smem>>
    %269 = vector.extract_strided_slice %263 {offsets = [0, 1, 0], sizes = [1, 1, 256], strides = [1, 1, 1]} : vector<1x2x256xf32> to vector<1x1x256xf32>
    %270 = vector.broadcast %268 : f32 to vector<1x1x256xf32>
    %271 = arith.mulf %270, %269 : vector<1x1x256xf32>
    %272 = arith.addf %267, %271 : vector<1x1x256xf32>
    %273 = arith.addf %262, %272 : vector<1x1x256xf32>
    %274 = vector.extract_strided_slice %13 {offsets = [0, 0, 112], sizes = [1, 2, 256], strides = [1, 1, 1]} : vector<1x2x435xf32> to vector<1x2x256xf32>
    %c17 = arith.constant 17 : index
    %275 = memref.load %arg1[%c17] : memref<98xf32, #tpu.memory_space<smem>>
    %276 = vector.extract_strided_slice %274 {offsets = [0, 0, 0], sizes = [1, 1, 256], strides = [1, 1, 1]} : vector<1x2x256xf32> to vector<1x1x256xf32>
    %277 = vector.broadcast %275 : f32 to vector<1x1x256xf32>
    %278 = arith.mulf %277, %276 : vector<1x1x256xf32>
    %c66 = arith.constant 66 : index
    %279 = memref.load %arg1[%c66] : memref<98xf32, #tpu.memory_space<smem>>
    %280 = vector.extract_strided_slice %274 {offsets = [0, 1, 0], sizes = [1, 1, 256], strides = [1, 1, 1]} : vector<1x2x256xf32> to vector<1x1x256xf32>
    %281 = vector.broadcast %279 : f32 to vector<1x1x256xf32>
    %282 = arith.mulf %281, %280 : vector<1x1x256xf32>
    %283 = arith.addf %278, %282 : vector<1x1x256xf32>
    %284 = arith.addf %273, %283 : vector<1x1x256xf32>
    %285 = vector.extract_strided_slice %13 {offsets = [0, 0, 128], sizes = [1, 2, 256], strides = [1, 1, 1]} : vector<1x2x435xf32> to vector<1x2x256xf32>
    %c24 = arith.constant 24 : index
    %286 = memref.load %arg1[%c24] : memref<98xf32, #tpu.memory_space<smem>>
    %287 = vector.extract_strided_slice %285 {offsets = [0, 0, 0], sizes = [1, 1, 256], strides = [1, 1, 1]} : vector<1x2x256xf32> to vector<1x1x256xf32>
    %288 = vector.broadcast %286 : f32 to vector<1x1x256xf32>
    %289 = arith.mulf %288, %287 : vector<1x1x256xf32>
    %c73 = arith.constant 73 : index
    %290 = memref.load %arg1[%c73] : memref<98xf32, #tpu.memory_space<smem>>
    %291 = vector.extract_strided_slice %285 {offsets = [0, 1, 0], sizes = [1, 1, 256], strides = [1, 1, 1]} : vector<1x2x256xf32> to vector<1x1x256xf32>
    %292 = vector.broadcast %290 : f32 to vector<1x1x256xf32>
    %293 = arith.mulf %292, %291 : vector<1x1x256xf32>
    %294 = arith.addf %289, %293 : vector<1x1x256xf32>
    %295 = arith.addf %284, %294 : vector<1x1x256xf32>
    %296 = vector.extract_strided_slice %13 {offsets = [0, 0, 144], sizes = [1, 2, 256], strides = [1, 1, 1]} : vector<1x2x435xf32> to vector<1x2x256xf32>
    %c31 = arith.constant 31 : index
    %297 = memref.load %arg1[%c31] : memref<98xf32, #tpu.memory_space<smem>>
    %298 = vector.extract_strided_slice %296 {offsets = [0, 0, 0], sizes = [1, 1, 256], strides = [1, 1, 1]} : vector<1x2x256xf32> to vector<1x1x256xf32>
    %299 = vector.broadcast %297 : f32 to vector<1x1x256xf32>
    %300 = arith.mulf %299, %298 : vector<1x1x256xf32>
    %c80 = arith.constant 80 : index
    %301 = memref.load %arg1[%c80] : memref<98xf32, #tpu.memory_space<smem>>
    %302 = vector.extract_strided_slice %296 {offsets = [0, 1, 0], sizes = [1, 1, 256], strides = [1, 1, 1]} : vector<1x2x256xf32> to vector<1x1x256xf32>
    %303 = vector.broadcast %301 : f32 to vector<1x1x256xf32>
    %304 = arith.mulf %303, %302 : vector<1x1x256xf32>
    %305 = arith.addf %300, %304 : vector<1x1x256xf32>
    %306 = arith.addf %295, %305 : vector<1x1x256xf32>
    %307 = vector.extract_strided_slice %13 {offsets = [0, 0, 160], sizes = [1, 2, 256], strides = [1, 1, 1]} : vector<1x2x435xf32> to vector<1x2x256xf32>
    %c38 = arith.constant 38 : index
    %308 = memref.load %arg1[%c38] : memref<98xf32, #tpu.memory_space<smem>>
    %309 = vector.extract_strided_slice %307 {offsets = [0, 0, 0], sizes = [1, 1, 256], strides = [1, 1, 1]} : vector<1x2x256xf32> to vector<1x1x256xf32>
    %310 = vector.broadcast %308 : f32 to vector<1x1x256xf32>
    %311 = arith.mulf %310, %309 : vector<1x1x256xf32>
    %c87 = arith.constant 87 : index
    %312 = memref.load %arg1[%c87] : memref<98xf32, #tpu.memory_space<smem>>
    %313 = vector.extract_strided_slice %307 {offsets = [0, 1, 0], sizes = [1, 1, 256], strides = [1, 1, 1]} : vector<1x2x256xf32> to vector<1x1x256xf32>
    %314 = vector.broadcast %312 : f32 to vector<1x1x256xf32>
    %315 = arith.mulf %314, %313 : vector<1x1x256xf32>
    %316 = arith.addf %311, %315 : vector<1x1x256xf32>
    %317 = arith.addf %306, %316 : vector<1x1x256xf32>
    %318 = vector.extract_strided_slice %13 {offsets = [0, 0, 176], sizes = [1, 2, 256], strides = [1, 1, 1]} : vector<1x2x435xf32> to vector<1x2x256xf32>
    %c45 = arith.constant 45 : index
    %319 = memref.load %arg1[%c45] : memref<98xf32, #tpu.memory_space<smem>>
    %320 = vector.extract_strided_slice %318 {offsets = [0, 0, 0], sizes = [1, 1, 256], strides = [1, 1, 1]} : vector<1x2x256xf32> to vector<1x1x256xf32>
    %321 = vector.broadcast %319 : f32 to vector<1x1x256xf32>
    %322 = arith.mulf %321, %320 : vector<1x1x256xf32>
    %c94 = arith.constant 94 : index
    %323 = memref.load %arg1[%c94] : memref<98xf32, #tpu.memory_space<smem>>
    %324 = vector.extract_strided_slice %318 {offsets = [0, 1, 0], sizes = [1, 1, 256], strides = [1, 1, 1]} : vector<1x2x256xf32> to vector<1x1x256xf32>
    %325 = vector.broadcast %323 : f32 to vector<1x1x256xf32>
    %326 = arith.mulf %325, %324 : vector<1x1x256xf32>
    %327 = arith.addf %322, %326 : vector<1x1x256xf32>
    %328 = arith.addf %317, %327 : vector<1x1x256xf32>
    %329 = vector.extract_strided_slice %14 {offsets = [3, 0, 0], sizes = [1, 1, 256], strides = [1, 1, 1]} : vector<7x1x256xf32> to vector<1x1x256xf32>
    %330 = arith.mulf %329, %328 : vector<1x1x256xf32>
    %331 = arith.addf %252, %330 : vector<1x1x256xf32>
    %332 = vector.extract_strided_slice %13 {offsets = [0, 0, 81], sizes = [1, 2, 256], strides = [1, 1, 1]} : vector<1x2x435xf32> to vector<1x2x256xf32>
    %c4 = arith.constant 4 : index
    %333 = memref.load %arg1[%c4] : memref<98xf32, #tpu.memory_space<smem>>
    %334 = vector.extract_strided_slice %332 {offsets = [0, 0, 0], sizes = [1, 1, 256], strides = [1, 1, 1]} : vector<1x2x256xf32> to vector<1x1x256xf32>
    %335 = vector.broadcast %333 : f32 to vector<1x1x256xf32>
    %336 = arith.mulf %335, %334 : vector<1x1x256xf32>
    %c53 = arith.constant 53 : index
    %337 = memref.load %arg1[%c53] : memref<98xf32, #tpu.memory_space<smem>>
    %338 = vector.extract_strided_slice %332 {offsets = [0, 1, 0], sizes = [1, 1, 256], strides = [1, 1, 1]} : vector<1x2x256xf32> to vector<1x1x256xf32>
    %339 = vector.broadcast %337 : f32 to vector<1x1x256xf32>
    %340 = arith.mulf %339, %338 : vector<1x1x256xf32>
    %341 = arith.addf %336, %340 : vector<1x1x256xf32>
    %342 = vector.extract_strided_slice %13 {offsets = [0, 0, 97], sizes = [1, 2, 256], strides = [1, 1, 1]} : vector<1x2x435xf32> to vector<1x2x256xf32>
    %c11 = arith.constant 11 : index
    %343 = memref.load %arg1[%c11] : memref<98xf32, #tpu.memory_space<smem>>
    %344 = vector.extract_strided_slice %342 {offsets = [0, 0, 0], sizes = [1, 1, 256], strides = [1, 1, 1]} : vector<1x2x256xf32> to vector<1x1x256xf32>
    %345 = vector.broadcast %343 : f32 to vector<1x1x256xf32>
    %346 = arith.mulf %345, %344 : vector<1x1x256xf32>
    %c60 = arith.constant 60 : index
    %347 = memref.load %arg1[%c60] : memref<98xf32, #tpu.memory_space<smem>>
    %348 = vector.extract_strided_slice %342 {offsets = [0, 1, 0], sizes = [1, 1, 256], strides = [1, 1, 1]} : vector<1x2x256xf32> to vector<1x1x256xf32>
    %349 = vector.broadcast %347 : f32 to vector<1x1x256xf32>
    %350 = arith.mulf %349, %348 : vector<1x1x256xf32>
    %351 = arith.addf %346, %350 : vector<1x1x256xf32>
    %352 = arith.addf %341, %351 : vector<1x1x256xf32>
    %353 = vector.extract_strided_slice %13 {offsets = [0, 0, 113], sizes = [1, 2, 256], strides = [1, 1, 1]} : vector<1x2x435xf32> to vector<1x2x256xf32>
    %c18 = arith.constant 18 : index
    %354 = memref.load %arg1[%c18] : memref<98xf32, #tpu.memory_space<smem>>
    %355 = vector.extract_strided_slice %353 {offsets = [0, 0, 0], sizes = [1, 1, 256], strides = [1, 1, 1]} : vector<1x2x256xf32> to vector<1x1x256xf32>
    %356 = vector.broadcast %354 : f32 to vector<1x1x256xf32>
    %357 = arith.mulf %356, %355 : vector<1x1x256xf32>
    %c67 = arith.constant 67 : index
    %358 = memref.load %arg1[%c67] : memref<98xf32, #tpu.memory_space<smem>>
    %359 = vector.extract_strided_slice %353 {offsets = [0, 1, 0], sizes = [1, 1, 256], strides = [1, 1, 1]} : vector<1x2x256xf32> to vector<1x1x256xf32>
    %360 = vector.broadcast %358 : f32 to vector<1x1x256xf32>
    %361 = arith.mulf %360, %359 : vector<1x1x256xf32>
    %362 = arith.addf %357, %361 : vector<1x1x256xf32>
    %363 = arith.addf %352, %362 : vector<1x1x256xf32>
    %364 = vector.extract_strided_slice %13 {offsets = [0, 0, 129], sizes = [1, 2, 256], strides = [1, 1, 1]} : vector<1x2x435xf32> to vector<1x2x256xf32>
    %c25 = arith.constant 25 : index
    %365 = memref.load %arg1[%c25] : memref<98xf32, #tpu.memory_space<smem>>
    %366 = vector.extract_strided_slice %364 {offsets = [0, 0, 0], sizes = [1, 1, 256], strides = [1, 1, 1]} : vector<1x2x256xf32> to vector<1x1x256xf32>
    %367 = vector.broadcast %365 : f32 to vector<1x1x256xf32>
    %368 = arith.mulf %367, %366 : vector<1x1x256xf32>
    %c74 = arith.constant 74 : index
    %369 = memref.load %arg1[%c74] : memref<98xf32, #tpu.memory_space<smem>>
    %370 = vector.extract_strided_slice %364 {offsets = [0, 1, 0], sizes = [1, 1, 256], strides = [1, 1, 1]} : vector<1x2x256xf32> to vector<1x1x256xf32>
    %371 = vector.broadcast %369 : f32 to vector<1x1x256xf32>
    %372 = arith.mulf %371, %370 : vector<1x1x256xf32>
    %373 = arith.addf %368, %372 : vector<1x1x256xf32>
    %374 = arith.addf %363, %373 : vector<1x1x256xf32>
    %375 = vector.extract_strided_slice %13 {offsets = [0, 0, 145], sizes = [1, 2, 256], strides = [1, 1, 1]} : vector<1x2x435xf32> to vector<1x2x256xf32>
    %c32 = arith.constant 32 : index
    %376 = memref.load %arg1[%c32] : memref<98xf32, #tpu.memory_space<smem>>
    %377 = vector.extract_strided_slice %375 {offsets = [0, 0, 0], sizes = [1, 1, 256], strides = [1, 1, 1]} : vector<1x2x256xf32> to vector<1x1x256xf32>
    %378 = vector.broadcast %376 : f32 to vector<1x1x256xf32>
    %379 = arith.mulf %378, %377 : vector<1x1x256xf32>
    %c81 = arith.constant 81 : index
    %380 = memref.load %arg1[%c81] : memref<98xf32, #tpu.memory_space<smem>>
    %381 = vector.extract_strided_slice %375 {offsets = [0, 1, 0], sizes = [1, 1, 256], strides = [1, 1, 1]} : vector<1x2x256xf32> to vector<1x1x256xf32>
    %382 = vector.broadcast %380 : f32 to vector<1x1x256xf32>
    %383 = arith.mulf %382, %381 : vector<1x1x256xf32>
    %384 = arith.addf %379, %383 : vector<1x1x256xf32>
    %385 = arith.addf %374, %384 : vector<1x1x256xf32>
    %386 = vector.extract_strided_slice %13 {offsets = [0, 0, 161], sizes = [1, 2, 256], strides = [1, 1, 1]} : vector<1x2x435xf32> to vector<1x2x256xf32>
    %c39 = arith.constant 39 : index
    %387 = memref.load %arg1[%c39] : memref<98xf32, #tpu.memory_space<smem>>
    %388 = vector.extract_strided_slice %386 {offsets = [0, 0, 0], sizes = [1, 1, 256], strides = [1, 1, 1]} : vector<1x2x256xf32> to vector<1x1x256xf32>
    %389 = vector.broadcast %387 : f32 to vector<1x1x256xf32>
    %390 = arith.mulf %389, %388 : vector<1x1x256xf32>
    %c88 = arith.constant 88 : index
    %391 = memref.load %arg1[%c88] : memref<98xf32, #tpu.memory_space<smem>>
    %392 = vector.extract_strided_slice %386 {offsets = [0, 1, 0], sizes = [1, 1, 256], strides = [1, 1, 1]} : vector<1x2x256xf32> to vector<1x1x256xf32>
    %393 = vector.broadcast %391 : f32 to vector<1x1x256xf32>
    %394 = arith.mulf %393, %392 : vector<1x1x256xf32>
    %395 = arith.addf %390, %394 : vector<1x1x256xf32>
    %396 = arith.addf %385, %395 : vector<1x1x256xf32>
    %397 = vector.extract_strided_slice %13 {offsets = [0, 0, 177], sizes = [1, 2, 256], strides = [1, 1, 1]} : vector<1x2x435xf32> to vector<1x2x256xf32>
    %c46 = arith.constant 46 : index
    %398 = memref.load %arg1[%c46] : memref<98xf32, #tpu.memory_space<smem>>
    %399 = vector.extract_strided_slice %397 {offsets = [0, 0, 0], sizes = [1, 1, 256], strides = [1, 1, 1]} : vector<1x2x256xf32> to vector<1x1x256xf32>
    %400 = vector.broadcast %398 : f32 to vector<1x1x256xf32>
    %401 = arith.mulf %400, %399 : vector<1x1x256xf32>
    %c95 = arith.constant 95 : index
    %402 = memref.load %arg1[%c95] : memref<98xf32, #tpu.memory_space<smem>>
    %403 = vector.extract_strided_slice %397 {offsets = [0, 1, 0], sizes = [1, 1, 256], strides = [1, 1, 1]} : vector<1x2x256xf32> to vector<1x1x256xf32>
    %404 = vector.broadcast %402 : f32 to vector<1x1x256xf32>
    %405 = arith.mulf %404, %403 : vector<1x1x256xf32>
    %406 = arith.addf %401, %405 : vector<1x1x256xf32>
    %407 = arith.addf %396, %406 : vector<1x1x256xf32>
    %408 = vector.extract_strided_slice %14 {offsets = [4, 0, 0], sizes = [1, 1, 256], strides = [1, 1, 1]} : vector<7x1x256xf32> to vector<1x1x256xf32>
    %409 = arith.mulf %408, %407 : vector<1x1x256xf32>
    %410 = arith.addf %331, %409 : vector<1x1x256xf32>
    %411 = vector.extract_strided_slice %13 {offsets = [0, 0, 82], sizes = [1, 2, 256], strides = [1, 1, 1]} : vector<1x2x435xf32> to vector<1x2x256xf32>
    %c5 = arith.constant 5 : index
    %412 = memref.load %arg1[%c5] : memref<98xf32, #tpu.memory_space<smem>>
    %413 = vector.extract_strided_slice %411 {offsets = [0, 0, 0], sizes = [1, 1, 256], strides = [1, 1, 1]} : vector<1x2x256xf32> to vector<1x1x256xf32>
    %414 = vector.broadcast %412 : f32 to vector<1x1x256xf32>
    %415 = arith.mulf %414, %413 : vector<1x1x256xf32>
    %c54 = arith.constant 54 : index
    %416 = memref.load %arg1[%c54] : memref<98xf32, #tpu.memory_space<smem>>
    %417 = vector.extract_strided_slice %411 {offsets = [0, 1, 0], sizes = [1, 1, 256], strides = [1, 1, 1]} : vector<1x2x256xf32> to vector<1x1x256xf32>
    %418 = vector.broadcast %416 : f32 to vector<1x1x256xf32>
    %419 = arith.mulf %418, %417 : vector<1x1x256xf32>
    %420 = arith.addf %415, %419 : vector<1x1x256xf32>
    %421 = vector.extract_strided_slice %13 {offsets = [0, 0, 98], sizes = [1, 2, 256], strides = [1, 1, 1]} : vector<1x2x435xf32> to vector<1x2x256xf32>
    %c12 = arith.constant 12 : index
    %422 = memref.load %arg1[%c12] : memref<98xf32, #tpu.memory_space<smem>>
    %423 = vector.extract_strided_slice %421 {offsets = [0, 0, 0], sizes = [1, 1, 256], strides = [1, 1, 1]} : vector<1x2x256xf32> to vector<1x1x256xf32>
    %424 = vector.broadcast %422 : f32 to vector<1x1x256xf32>
    %425 = arith.mulf %424, %423 : vector<1x1x256xf32>
    %c61 = arith.constant 61 : index
    %426 = memref.load %arg1[%c61] : memref<98xf32, #tpu.memory_space<smem>>
    %427 = vector.extract_strided_slice %421 {offsets = [0, 1, 0], sizes = [1, 1, 256], strides = [1, 1, 1]} : vector<1x2x256xf32> to vector<1x1x256xf32>
    %428 = vector.broadcast %426 : f32 to vector<1x1x256xf32>
    %429 = arith.mulf %428, %427 : vector<1x1x256xf32>
    %430 = arith.addf %425, %429 : vector<1x1x256xf32>
    %431 = arith.addf %420, %430 : vector<1x1x256xf32>
    %432 = vector.extract_strided_slice %13 {offsets = [0, 0, 114], sizes = [1, 2, 256], strides = [1, 1, 1]} : vector<1x2x435xf32> to vector<1x2x256xf32>
    %c19 = arith.constant 19 : index
    %433 = memref.load %arg1[%c19] : memref<98xf32, #tpu.memory_space<smem>>
    %434 = vector.extract_strided_slice %432 {offsets = [0, 0, 0], sizes = [1, 1, 256], strides = [1, 1, 1]} : vector<1x2x256xf32> to vector<1x1x256xf32>
    %435 = vector.broadcast %433 : f32 to vector<1x1x256xf32>
    %436 = arith.mulf %435, %434 : vector<1x1x256xf32>
    %c68 = arith.constant 68 : index
    %437 = memref.load %arg1[%c68] : memref<98xf32, #tpu.memory_space<smem>>
    %438 = vector.extract_strided_slice %432 {offsets = [0, 1, 0], sizes = [1, 1, 256], strides = [1, 1, 1]} : vector<1x2x256xf32> to vector<1x1x256xf32>
    %439 = vector.broadcast %437 : f32 to vector<1x1x256xf32>
    %440 = arith.mulf %439, %438 : vector<1x1x256xf32>
    %441 = arith.addf %436, %440 : vector<1x1x256xf32>
    %442 = arith.addf %431, %441 : vector<1x1x256xf32>
    %443 = vector.extract_strided_slice %13 {offsets = [0, 0, 130], sizes = [1, 2, 256], strides = [1, 1, 1]} : vector<1x2x435xf32> to vector<1x2x256xf32>
    %c26 = arith.constant 26 : index
    %444 = memref.load %arg1[%c26] : memref<98xf32, #tpu.memory_space<smem>>
    %445 = vector.extract_strided_slice %443 {offsets = [0, 0, 0], sizes = [1, 1, 256], strides = [1, 1, 1]} : vector<1x2x256xf32> to vector<1x1x256xf32>
    %446 = vector.broadcast %444 : f32 to vector<1x1x256xf32>
    %447 = arith.mulf %446, %445 : vector<1x1x256xf32>
    %c75 = arith.constant 75 : index
    %448 = memref.load %arg1[%c75] : memref<98xf32, #tpu.memory_space<smem>>
    %449 = vector.extract_strided_slice %443 {offsets = [0, 1, 0], sizes = [1, 1, 256], strides = [1, 1, 1]} : vector<1x2x256xf32> to vector<1x1x256xf32>
    %450 = vector.broadcast %448 : f32 to vector<1x1x256xf32>
    %451 = arith.mulf %450, %449 : vector<1x1x256xf32>
    %452 = arith.addf %447, %451 : vector<1x1x256xf32>
    %453 = arith.addf %442, %452 : vector<1x1x256xf32>
    %454 = vector.extract_strided_slice %13 {offsets = [0, 0, 146], sizes = [1, 2, 256], strides = [1, 1, 1]} : vector<1x2x435xf32> to vector<1x2x256xf32>
    %c33 = arith.constant 33 : index
    %455 = memref.load %arg1[%c33] : memref<98xf32, #tpu.memory_space<smem>>
    %456 = vector.extract_strided_slice %454 {offsets = [0, 0, 0], sizes = [1, 1, 256], strides = [1, 1, 1]} : vector<1x2x256xf32> to vector<1x1x256xf32>
    %457 = vector.broadcast %455 : f32 to vector<1x1x256xf32>
    %458 = arith.mulf %457, %456 : vector<1x1x256xf32>
    %c82 = arith.constant 82 : index
    %459 = memref.load %arg1[%c82] : memref<98xf32, #tpu.memory_space<smem>>
    %460 = vector.extract_strided_slice %454 {offsets = [0, 1, 0], sizes = [1, 1, 256], strides = [1, 1, 1]} : vector<1x2x256xf32> to vector<1x1x256xf32>
    %461 = vector.broadcast %459 : f32 to vector<1x1x256xf32>
    %462 = arith.mulf %461, %460 : vector<1x1x256xf32>
    %463 = arith.addf %458, %462 : vector<1x1x256xf32>
    %464 = arith.addf %453, %463 : vector<1x1x256xf32>
    %465 = vector.extract_strided_slice %13 {offsets = [0, 0, 162], sizes = [1, 2, 256], strides = [1, 1, 1]} : vector<1x2x435xf32> to vector<1x2x256xf32>
    %c40 = arith.constant 40 : index
    %466 = memref.load %arg1[%c40] : memref<98xf32, #tpu.memory_space<smem>>
    %467 = vector.extract_strided_slice %465 {offsets = [0, 0, 0], sizes = [1, 1, 256], strides = [1, 1, 1]} : vector<1x2x256xf32> to vector<1x1x256xf32>
    %468 = vector.broadcast %466 : f32 to vector<1x1x256xf32>
    %469 = arith.mulf %468, %467 : vector<1x1x256xf32>
    %c89 = arith.constant 89 : index
    %470 = memref.load %arg1[%c89] : memref<98xf32, #tpu.memory_space<smem>>
    %471 = vector.extract_strided_slice %465 {offsets = [0, 1, 0], sizes = [1, 1, 256], strides = [1, 1, 1]} : vector<1x2x256xf32> to vector<1x1x256xf32>
    %472 = vector.broadcast %470 : f32 to vector<1x1x256xf32>
    %473 = arith.mulf %472, %471 : vector<1x1x256xf32>
    %474 = arith.addf %469, %473 : vector<1x1x256xf32>
    %475 = arith.addf %464, %474 : vector<1x1x256xf32>
    %476 = vector.extract_strided_slice %13 {offsets = [0, 0, 178], sizes = [1, 2, 256], strides = [1, 1, 1]} : vector<1x2x435xf32> to vector<1x2x256xf32>
    %c47 = arith.constant 47 : index
    %477 = memref.load %arg1[%c47] : memref<98xf32, #tpu.memory_space<smem>>
    %478 = vector.extract_strided_slice %476 {offsets = [0, 0, 0], sizes = [1, 1, 256], strides = [1, 1, 1]} : vector<1x2x256xf32> to vector<1x1x256xf32>
    %479 = vector.broadcast %477 : f32 to vector<1x1x256xf32>
    %480 = arith.mulf %479, %478 : vector<1x1x256xf32>
    %c96 = arith.constant 96 : index
    %481 = memref.load %arg1[%c96] : memref<98xf32, #tpu.memory_space<smem>>
    %482 = vector.extract_strided_slice %476 {offsets = [0, 1, 0], sizes = [1, 1, 256], strides = [1, 1, 1]} : vector<1x2x256xf32> to vector<1x1x256xf32>
    %483 = vector.broadcast %481 : f32 to vector<1x1x256xf32>
    %484 = arith.mulf %483, %482 : vector<1x1x256xf32>
    %485 = arith.addf %480, %484 : vector<1x1x256xf32>
    %486 = arith.addf %475, %485 : vector<1x1x256xf32>
    %487 = vector.extract_strided_slice %14 {offsets = [5, 0, 0], sizes = [1, 1, 256], strides = [1, 1, 1]} : vector<7x1x256xf32> to vector<1x1x256xf32>
    %488 = arith.mulf %487, %486 : vector<1x1x256xf32>
    %489 = arith.addf %410, %488 : vector<1x1x256xf32>
    %490 = vector.extract_strided_slice %13 {offsets = [0, 0, 83], sizes = [1, 2, 256], strides = [1, 1, 1]} : vector<1x2x435xf32> to vector<1x2x256xf32>
    %c6 = arith.constant 6 : index
    %491 = memref.load %arg1[%c6] : memref<98xf32, #tpu.memory_space<smem>>
    %492 = vector.extract_strided_slice %490 {offsets = [0, 0, 0], sizes = [1, 1, 256], strides = [1, 1, 1]} : vector<1x2x256xf32> to vector<1x1x256xf32>
    %493 = vector.broadcast %491 : f32 to vector<1x1x256xf32>
    %494 = arith.mulf %493, %492 : vector<1x1x256xf32>
    %c55 = arith.constant 55 : index
    %495 = memref.load %arg1[%c55] : memref<98xf32, #tpu.memory_space<smem>>
    %496 = vector.extract_strided_slice %490 {offsets = [0, 1, 0], sizes = [1, 1, 256], strides = [1, 1, 1]} : vector<1x2x256xf32> to vector<1x1x256xf32>
    %497 = vector.broadcast %495 : f32 to vector<1x1x256xf32>
    %498 = arith.mulf %497, %496 : vector<1x1x256xf32>
    %499 = arith.addf %494, %498 : vector<1x1x256xf32>
    %500 = vector.extract_strided_slice %13 {offsets = [0, 0, 99], sizes = [1, 2, 256], strides = [1, 1, 1]} : vector<1x2x435xf32> to vector<1x2x256xf32>
    %c13 = arith.constant 13 : index
    %501 = memref.load %arg1[%c13] : memref<98xf32, #tpu.memory_space<smem>>
    %502 = vector.extract_strided_slice %500 {offsets = [0, 0, 0], sizes = [1, 1, 256], strides = [1, 1, 1]} : vector<1x2x256xf32> to vector<1x1x256xf32>
    %503 = vector.broadcast %501 : f32 to vector<1x1x256xf32>
    %504 = arith.mulf %503, %502 : vector<1x1x256xf32>
    %c62 = arith.constant 62 : index
    %505 = memref.load %arg1[%c62] : memref<98xf32, #tpu.memory_space<smem>>
    %506 = vector.extract_strided_slice %500 {offsets = [0, 1, 0], sizes = [1, 1, 256], strides = [1, 1, 1]} : vector<1x2x256xf32> to vector<1x1x256xf32>
    %507 = vector.broadcast %505 : f32 to vector<1x1x256xf32>
    %508 = arith.mulf %507, %506 : vector<1x1x256xf32>
    %509 = arith.addf %504, %508 : vector<1x1x256xf32>
    %510 = arith.addf %499, %509 : vector<1x1x256xf32>
    %511 = vector.extract_strided_slice %13 {offsets = [0, 0, 115], sizes = [1, 2, 256], strides = [1, 1, 1]} : vector<1x2x435xf32> to vector<1x2x256xf32>
    %c20 = arith.constant 20 : index
    %512 = memref.load %arg1[%c20] : memref<98xf32, #tpu.memory_space<smem>>
    %513 = vector.extract_strided_slice %511 {offsets = [0, 0, 0], sizes = [1, 1, 256], strides = [1, 1, 1]} : vector<1x2x256xf32> to vector<1x1x256xf32>
    %514 = vector.broadcast %512 : f32 to vector<1x1x256xf32>
    %515 = arith.mulf %514, %513 : vector<1x1x256xf32>
    %c69 = arith.constant 69 : index
    %516 = memref.load %arg1[%c69] : memref<98xf32, #tpu.memory_space<smem>>
    %517 = vector.extract_strided_slice %511 {offsets = [0, 1, 0], sizes = [1, 1, 256], strides = [1, 1, 1]} : vector<1x2x256xf32> to vector<1x1x256xf32>
    %518 = vector.broadcast %516 : f32 to vector<1x1x256xf32>
    %519 = arith.mulf %518, %517 : vector<1x1x256xf32>
    %520 = arith.addf %515, %519 : vector<1x1x256xf32>
    %521 = arith.addf %510, %520 : vector<1x1x256xf32>
    %522 = vector.extract_strided_slice %13 {offsets = [0, 0, 131], sizes = [1, 2, 256], strides = [1, 1, 1]} : vector<1x2x435xf32> to vector<1x2x256xf32>
    %c27 = arith.constant 27 : index
    %523 = memref.load %arg1[%c27] : memref<98xf32, #tpu.memory_space<smem>>
    %524 = vector.extract_strided_slice %522 {offsets = [0, 0, 0], sizes = [1, 1, 256], strides = [1, 1, 1]} : vector<1x2x256xf32> to vector<1x1x256xf32>
    %525 = vector.broadcast %523 : f32 to vector<1x1x256xf32>
    %526 = arith.mulf %525, %524 : vector<1x1x256xf32>
    %c76 = arith.constant 76 : index
    %527 = memref.load %arg1[%c76] : memref<98xf32, #tpu.memory_space<smem>>
    %528 = vector.extract_strided_slice %522 {offsets = [0, 1, 0], sizes = [1, 1, 256], strides = [1, 1, 1]} : vector<1x2x256xf32> to vector<1x1x256xf32>
    %529 = vector.broadcast %527 : f32 to vector<1x1x256xf32>
    %530 = arith.mulf %529, %528 : vector<1x1x256xf32>
    %531 = arith.addf %526, %530 : vector<1x1x256xf32>
    %532 = arith.addf %521, %531 : vector<1x1x256xf32>
    %533 = vector.extract_strided_slice %13 {offsets = [0, 0, 147], sizes = [1, 2, 256], strides = [1, 1, 1]} : vector<1x2x435xf32> to vector<1x2x256xf32>
    %c34 = arith.constant 34 : index
    %534 = memref.load %arg1[%c34] : memref<98xf32, #tpu.memory_space<smem>>
    %535 = vector.extract_strided_slice %533 {offsets = [0, 0, 0], sizes = [1, 1, 256], strides = [1, 1, 1]} : vector<1x2x256xf32> to vector<1x1x256xf32>
    %536 = vector.broadcast %534 : f32 to vector<1x1x256xf32>
    %537 = arith.mulf %536, %535 : vector<1x1x256xf32>
    %c83 = arith.constant 83 : index
    %538 = memref.load %arg1[%c83] : memref<98xf32, #tpu.memory_space<smem>>
    %539 = vector.extract_strided_slice %533 {offsets = [0, 1, 0], sizes = [1, 1, 256], strides = [1, 1, 1]} : vector<1x2x256xf32> to vector<1x1x256xf32>
    %540 = vector.broadcast %538 : f32 to vector<1x1x256xf32>
    %541 = arith.mulf %540, %539 : vector<1x1x256xf32>
    %542 = arith.addf %537, %541 : vector<1x1x256xf32>
    %543 = arith.addf %532, %542 : vector<1x1x256xf32>
    %544 = vector.extract_strided_slice %13 {offsets = [0, 0, 163], sizes = [1, 2, 256], strides = [1, 1, 1]} : vector<1x2x435xf32> to vector<1x2x256xf32>
    %c41 = arith.constant 41 : index
    %545 = memref.load %arg1[%c41] : memref<98xf32, #tpu.memory_space<smem>>
    %546 = vector.extract_strided_slice %544 {offsets = [0, 0, 0], sizes = [1, 1, 256], strides = [1, 1, 1]} : vector<1x2x256xf32> to vector<1x1x256xf32>
    %547 = vector.broadcast %545 : f32 to vector<1x1x256xf32>
    %548 = arith.mulf %547, %546 : vector<1x1x256xf32>
    %c90 = arith.constant 90 : index
    %549 = memref.load %arg1[%c90] : memref<98xf32, #tpu.memory_space<smem>>
    %550 = vector.extract_strided_slice %544 {offsets = [0, 1, 0], sizes = [1, 1, 256], strides = [1, 1, 1]} : vector<1x2x256xf32> to vector<1x1x256xf32>
    %551 = vector.broadcast %549 : f32 to vector<1x1x256xf32>
    %552 = arith.mulf %551, %550 : vector<1x1x256xf32>
    %553 = arith.addf %548, %552 : vector<1x1x256xf32>
    %554 = arith.addf %543, %553 : vector<1x1x256xf32>
    %555 = vector.extract_strided_slice %13 {offsets = [0, 0, 179], sizes = [1, 2, 256], strides = [1, 1, 1]} : vector<1x2x435xf32> to vector<1x2x256xf32>
    %c48 = arith.constant 48 : index
    %556 = memref.load %arg1[%c48] : memref<98xf32, #tpu.memory_space<smem>>
    %557 = vector.extract_strided_slice %555 {offsets = [0, 0, 0], sizes = [1, 1, 256], strides = [1, 1, 1]} : vector<1x2x256xf32> to vector<1x1x256xf32>
    %558 = vector.broadcast %556 : f32 to vector<1x1x256xf32>
    %559 = arith.mulf %558, %557 : vector<1x1x256xf32>
    %c97 = arith.constant 97 : index
    %560 = memref.load %arg1[%c97] : memref<98xf32, #tpu.memory_space<smem>>
    %561 = vector.extract_strided_slice %555 {offsets = [0, 1, 0], sizes = [1, 1, 256], strides = [1, 1, 1]} : vector<1x2x256xf32> to vector<1x1x256xf32>
    %562 = vector.broadcast %560 : f32 to vector<1x1x256xf32>
    %563 = arith.mulf %562, %561 : vector<1x1x256xf32>
    %564 = arith.addf %559, %563 : vector<1x1x256xf32>
    %565 = arith.addf %554, %564 : vector<1x1x256xf32>
    %566 = vector.extract_strided_slice %14 {offsets = [6, 0, 0], sizes = [1, 1, 256], strides = [1, 1, 1]} : vector<7x1x256xf32> to vector<1x1x256xf32>
    %567 = arith.mulf %566, %565 : vector<1x1x256xf32>
    %568 = arith.addf %489, %567 : vector<1x1x256xf32>
    %c0_24 = arith.constant 0 : index
    %569 = memref.load %arg2[%c0_24] : memref<1xf32, #tpu.memory_space<smem>>
    %570 = vector.broadcast %569 : f32 to vector<1x1x256xf32>
    %571 = arith.addf %568, %570 : vector<1x1x256xf32>
    %572 = arith.negf %571 : vector<1x1x256xf32>
    %573 = math.exp %572 : vector<1x1x256xf32>
    %cst_25 = arith.constant 1.000000e+00 : f32
    %574 = vector.broadcast %cst_25 : f32 to vector<1x1x256xf32>
    %575 = arith.addf %574, %573 : vector<1x1x256xf32>
    %576 = arith.divf %574, %575 : vector<1x1x256xf32>
    %c0_26 = arith.constant 0 : index
    %c0_27 = arith.constant 0 : index
    %c0_28 = arith.constant 0 : index
    %577 = vector.load %arg4[%c0_26, %c0_27, %c0_28] : memref<1x4x256xf32, #tpu.memory_space<vmem>>, vector<1x4x256xf32>
    %578 = vector.broadcast %576 : vector<1x1x256xf32> to vector<1x4x256xf32>
    %579 = arith.mulf %578, %577 : vector<1x4x256xf32>
    %c0_29 = arith.constant 0 : index
    %c0_30 = arith.constant 0 : index
    %c0_31 = arith.constant 0 : index
    %580 = vector.load %arg5[%c0_29, %c0_30, %c0_31] : memref<1x4x256xf32, #tpu.memory_space<vmem>>, vector<1x4x256xf32>
    tpu.vector_store %arg5[%c0_29, %c0_30, %c0_31], %579 {strides = array<i32>} : memref<1x4x256xf32, #tpu.memory_space<vmem>>, vector<1x4x256xf32>,
    return
  }
  func.func @transform_0(%arg0: i32) -> i32 {
    %c0_i32 = arith.constant 0 : i32
    %c0_i32_0 = arith.constant 0 : i32
    return %c0_i32 : i32
  }
  func.func @transform_1(%arg0: i32) -> i32 {
    %c0_i32 = arith.constant 0 : i32
    %c0_i32_0 = arith.constant 0 : i32
    return %c0_i32 : i32
  }
  func.func @transform_2(%arg0: i32) -> (i32, i32, i32) {
    %c0_i32 = arith.constant 0 : i32
    %c0_i32_0 = arith.constant 0 : i32
    %c0_i32_1 = arith.constant 0 : i32
    %c0_i32_2 = arith.constant 0 : i32
    return %c0_i32, %c0_i32_0, %c0_i32_1 : i32, i32, i32
  }
  func.func @transform_3(%arg0: i32) -> (i32, i32, i32) {
    %c0_i32 = arith.constant 0 : i32
    %c0_i32_0 = arith.constant 0 : i32
    %c0_i32_1 = arith.constant 0 : i32
    return %arg0, %c0_i32, %c0_i32_0 : i32, i32, i32
  }
  func.func @transform_4(%arg0: i32) -> (i32, i32, i32) {
    %c0_i32 = arith.constant 0 : i32
    %c0_i32_0 = arith.constant 0 : i32
    %c0_i32_1 = arith.constant 0 : i32
    return %arg0, %c0_i32, %c0_i32_0 : i32, i32, i32
  }
}

</mosaic_0001>

<bundles_post_ra>
// kernel: tpu_custom_call.1
= control target key start
LH: loop header
LB: loop body
LE: loop exit
PB: predicated region body
PF: predicated region fallthrough
CT: control target
= control target key end

     0   :  { %s2788_s0 = inlined_call_operand.vmem [shape: f32[98], index: 0, kind: input, shape index: {}]   ;;  %s2789_s1 = inlined_call_operand.<no memory space> [shape: f32[1], index: 1, kind: input, shape index: {}]   ;;  %s2790_s2 = inlined_call_operand.hbm [shape: f32[7,1,256], index: 2, kind: input, shape index: {}]   ;;  %s2791_s3 = inlined_call_operand.hbm [shape: f32[2,4,256], index: 3, kind: input, shape index: {}]   ;;  %s2792_s4 = inlined_call_operand.hbm [shape: f32[2,4,256], index: 4, kind: output, shape index: {}]  }
   0x1   :  { %9 = sst [smem:[#allocation3]] %s2789_s1 }
   0x2   :  { %10 = vsyncpa [#allocation7], 0 }
   0x3   :  { %11 = vsyncpa [#allocation5], 0 }
   0x4   :  { %12 = vsyncpa [#allocation10], 0 }
   0x5   :  { %14 = vsyncpa [#allocation10 + $0x1], 0 }
   0x6   :  { %15 = vsyncpa [#allocation6], 0 }
   0x7   :  { %17 = vsyncpa [#allocation6 + $0x1], 0  ;;  %s2084_s17 = smov 0   ;;  %s2086_s18 = smov 0  }
   0x8   :  { %s2088_s19 = smov 0   ;;  %s2090_s20 = smov 0  }
   0x9 LB: > { %s2105_s1 = sadd.s32 4294967295, %s2017_s20   ;;  %s1592_s21 = sadd.s32 4294967294, %s2017_s20   ;;  %s2017_s20 = sphi %s2090_s20, %s2815_s20   ;;  %s2013_s19 = sphi %s2088_s19, %s2814_s19   ;;  %s2009_s18 = sphi %s2086_s18, %s2813_s18   ;;  %s2005_s17 = sphi %s2084_s17, %s2812_s17  }
   0xa   : > { %p106_p0 = scmp.ne.s32.totalorder %s2009_s18, %s2005_s17  ;;  %p107_p1 = scmp.eq.s32.totalorder %s2105_s1, 0 }
   0xb   : > { %p130_p2 = scmp.eq.s32.totalorder %s2105_s1, 1  ;;  %p136_p3 = scmp.eq.s32.totalorder %s1592_s21, 1 }
   0xc   : > { %p2114_p4 = por %p107_p1, %p106_p0  ;;  %p1593_p5 = scmp.ge.s32.totalorder %s2017_s20, 1 }
   0xd   : > { %p2119_p6 = por %p136_p3, %p106_p0  ;;  %p143_p7 = scmp.lt.s32.totalorder %s2017_s20, 3 }
   0xe   : > { %s155_s26 = sshll.u32 %s2788_s0, 4  ;;  %s167_s30 = sshll.u32 %s2790_s2, 4  ;;  %s156_s26 = int_to_ptr.vmem [resolvable:$true] %s155_s26  ;;  %s168_s30 = int_to_ptr.hbm [resolvable:$true] %s167_s30 }
   0xf   : > { %p2127_p8 = pnand %p1593_p5, %p143_p7  ;;  %s2019_s5 = smov [#allocation8]  }
  0x10   : > { %s169_s6 = sshll.u32 %s2019_s5, 4  ;;  %s2020_s7 = smov [#allocation4]   ;;  %s170_s6 = int_to_ptr.vmem [resolvable:$true] %s169_s6 }
  0x11   : > { %p1771_p10 = pneg %p2127_p8  ;;  %s2021_s8 = smov 32  }
  0x12   : > { %s2022_s9 = smov 2   ;;  %s2140_s10 = sadd.s32 1, %s2017_s20  }
  0x13   : > { %p1772_p11 = pnand %p1771_p10, %p107_p1  ;;  %s90_s11 = ssub.s32 %s2017_s20, %s2140_s10 }
  0x14   : > { %p91_p12 = scmp.eq.s32.totalorder %s90_s11, 0  ;;  %s93_s12 = sadd.s32 1, %s2013_s19 }
  0x15   : > { %1774 = dma.vmem_to_smem (!%p1772_p11), %s156_s26, 16, %s2020_s7, [#allocation7]  }
  0x16   : > { %1777 = dma.hbm_to_vmem [thread:$0]  (!%p1772_p11), %s168_s30, 224, %s170_s6, [#allocation5], %s2021_s8, %s2021_s8, %s2022_s9  }
  0x17   : > { %p100_p13 = scmp.ne.s32.totalorder %s2013_s19, %s2009_s18  ;;  %p101_p0 = scmp.eq.s32.totalorder %s2017_s20, 0 }
  0x18   : > { %s2149_s13 = scalar_select %p91_p12, %s2013_s19, %s93_s12  }
  0x19   : > { %p102_p3 = por %p101_p0, %p100_p13  ;;  %p2153_p5 = por %p130_p2, %p100_p13 }
  0x1a   : > { %p1788_p7 = scmp.lt.s32.totalorder %s2017_s20, 2  ;;  %s183_s15 = sand.u32 1, %s2013_s19  }
  0x1b   : > { %s1597_s16 = sshll.u32 %s183_s15, 3  ;;  %s1757_s21 = sshll.u32 %s2017_s20, 3 }
  0x1c   : > { %s192_s26 = scalar_lea.hbm %s2791_s3, %s1757_s21  ;;  %s187_s28 = scalar_lea.vmem [#allocation9], %s1597_s16 }
  0x1d   : > { %s196_s29 = sshll.u32 %s187_s28, 4  ;;  %s194_s30 = sshll.u32 %s192_s26, 4  ;;  %s197_s29 = int_to_ptr.vmem [resolvable:$true] %s196_s29  ;;  %s195_s30 = int_to_ptr.hbm [resolvable:$true] %s194_s30 }
  0x1e   : > { %p2163_p10 = pnand %p1788_p7, %p102_p3  ;;  %s184_s6 = scalar_lea.sflag [#allocation10], %s183_s15 }
  0x1f   : > { %s1913_s7 = sshra.s32 %s195_s30, 4  ;;  %s1920_s12 = scalar_lea.hbm %s2791_s3, 16  ;;  %s1914_s7 = int_to_ptr.hbm [resolvable:$true] %s1913_s7 }
  0x20   : > { %s1915_s8 = scalar_lea.hbm %s1914_s7, 8  ;;  %p1917_p11 = pneg %p2163_p10 }
  0x21   : > { %p1916_p2 = scmp.ne.s32.totalorder %s1914_s7, %s1915_s8  ;;  %p1921_p0 = scmp.lt.s32.totalorder %s1914_s7, %s2791_s3 }
  0x22   : > { %p1922_p3 = scmp.lt.s32.totalorder %s1920_s12, %s1915_s8 }
  0x23   : > { %p1918_p12 = pnand %p1917_p11, %p1916_p2 }
  0x24   : > { %p1923_p7 = por %p1922_p3, %p1921_p0 }
  0x25   : > { %p1919_p13 = pneg %p1918_p12 }
  0x27   : > { %p1924_p9 = pnand %p1923_p7, %p1919_p13 }
  0x29   : > { %1927 = shalt.err (!%p1924_p9)
}
  0x2a   : > { %1781 = dma.hbm_to_vmem [thread:$0]  (!%p2163_p10), %s195_s30, 128, %s197_s29, %s184_s6  }
  0x2b   : > { %205 = sbr.rel (%p2127_p8) target bundleno = 584 (0x248), region = 36 }
  0x30   : > { %1988 = dma.done.wait (%p107_p1), [#allocation7], 16  }
  0x31   : > { %1990 = vsyncadd (%p107_p1), [#allocation7], 4294967280 }
  0x32   : > { %1992 = dma.done.wait (%p107_p1), [#allocation5], 224  }
  0x33   : > { %1994 = vsyncadd (%p107_p1), [#allocation5], 4294967072  ;;  %s2188_s15 = sand.u32 1, %s2009_s18  }
  0x34   : > { %s2793_s27 = sshll.u32 %s2188_s15, 3  ;;  %s218_s24 = scalar_lea.sflag [#allocation10], %s2188_s15 }
  0x35   : > { %s2194_s25 = scalar_lea.vmem [#allocation9], %s2793_s27 }
  0x36   : > { %1996 = dma.done.wait (%p2114_p4), %s218_s24, 128  }
  0x37   : > { %1998 = vsyncadd (%p2114_p4), %s218_s24, 4294967168 }
  0x38   : > { %227 = sfence }
  0x39   : > { %v248_v0 = vld [vmem:[%s2194_s25] sm:$0xff]  ;;  %vm299_vm0 = vcmask 410624   ;;  %v2023_v1 = vmov 4.0   ;;  %v2024_v2 = vmov 0.0   ;;  %vm255_vm1 = vcmask 1043456   ;;  %s2025_s22 = smov 114  }
  0x3a   : > { %250 = vst [vmem:[#allocation1] ss:$2 sm:$0xff] %v248_v0  ;;  %1861 = vrcp.f32 %v2023_v1  ;;  %v307_v22 = vlaneseq  ;;  %vm304_vm2 = vcmask 1040384   ;;  %s2026_s26 = smov 115   ;;  %s2027_s28 = smov 99   ;;  %vm429_vm5 = vcmask 809984  }
  0x3b   : > { %298 = vst [vmem:[#allocation2] sm:$0x3] %v2024_v2  ;;  %s2796_s29 = smov 82   ;;  %s2794_s30 = smov 83   ;;  %vm561_vm6 = vcmask 932864   ;;  %vm403_vm7 = vcmask 941056  }
  0x3c   : > { %300 = vst.msk [vmem:[#allocation2 + $0x6] sm:$0x3] %vm299_vm0, %v2024_v2  ;;  %vm2205_vm3 = vcmp.lt.s32.totalorder %v307_v22, 256  ;;  %s2030_s5 = smov 113   ;;  %s2031_s6 = smov 127   ;;  %vm717_vm8 = vcmask 924672  }
  0x3d   : > { %s2032_s7 = smov 98   ;;  %s2033_s8 = smov 112   ;;  %vm612_vm9 = vcmask 670720   ;;  %vm454_vm10 = vcmask 678912   ;;  %vm354_vm11 = vcmask 916480   ;;  %vm1009_vm12 = vcmask 1039360  }
  0x3e   : > { %s1608_s9 = sld [smem:[#allocation4 + $0x38]]  ;;  %s2034_s12 = smov 111   ;;  %vm587_vm13 = vcmask 801792   ;;  %vm373_vm14 = vcmask 785408   ;;  %vm1034_vm15 = vcmask 908288   ;;  %vm743_vm0 = vcmask 793600  }
  0x3f   : > { %s1607_s11 = sld [smem:[#allocation4 + $0x7]]  ;;  %s2035_s16 = smov 97  }
  0x40   : > { %v1862_v3 = vpop.eup %1861  ;;  %s1614_s21 = sld [smem:[#allocation4 + $0x46]]  ;;  %s2036_s24 = smov 96  }
  0x41   : > { %v251_v4 = vld.sshfl [vmem:[#allocation1] sm:$0xff pattern:$0x75316420]  ;;  %v252_v5 = vld.sshfl [vmem:[#allocation1 + $0x8] sm:$0xff pattern:$0x75316420]  ;;  %vm294_vm4 = vweird.f32 %v1862_v3 }
  0x42   : > { %v256_v6 = vsel %vm255_vm1, %v251_v4, -inf  ;;  %v263_v7 = vsel %vm255_vm1, %v252_v5, -inf  ;;  %270 = vst [vmem:[#allocation1] ss:$2 sm:$0xff] %v248_v0  ;;  %v290_v10 = vmul.f32 4.0, %v1862_v3  ;;  %s2256_s27 = sld [smem:[#allocation4 + $0x40]] }
  0x43   : > { %v257_v8 = vrot.slane %v256_v6, 4  ;;  %v264_v9 = vrot.slane %v263_v7, 4 }
  0x44   : > { %v291_v15 = vsub.f32 1.0, %v290_v10  ;;  %v343_v50 = vstv %s1608_s9  ;;  %s2040_s9 = smov 126  }
  0x45   : > { %v258_v11 = vmax.f32 %v256_v6, %v257_v8  ;;  %v265_v12 = vmax.f32 %v263_v7, %v264_v9  ;;  %v340_v52 = vstv %s1607_s11  ;;  %s2041_s11 = smov 125  }
  0x46   : > { %v292_v27 = vmul.f32 %v1862_v3, %v291_v15  ;;  %v381_v55 = vstv %s1614_s21  ;;  %s2042_s21 = smov 109  }
  0x47   : > { %v259_v13 = vrot.slane %v258_v11, 2  ;;  %v266_v14 = vrot.slane %v265_v12, 2 }
  0x48   : > { %v293_v36 = vadd.f32 %v1862_v3, %v292_v27 }
  0x49   : > { %v260_v16 = vmax.f32 %v258_v11, %v259_v13  ;;  %v267_v17 = vmax.f32 %v265_v12, %v266_v14  ;;  %v271_v18 = vld.sshfl [vmem:[#allocation1] sm:$0xff pattern:$0x75316420]  ;;  %v272_v19 = vld.sshfl [vmem:[#allocation1 + $0x8] sm:$0xff pattern:$0x75316420] }
  0x4a   : > { %v275_v20 = vsel %vm255_vm1, %v271_v18, 0.0  ;;  %v282_v21 = vsel %vm255_vm1, %v272_v19, 0.0  ;;  %v295_v42 = vsel %vm294_vm4, %v1862_v3, %v293_v36  ;;  %v523_v18 = vstv %s2256_s27  ;;  %s2292_s27 = sld [smem:[#allocation4 + $0x10]] }
  0x4b   : > { %v261_v23 = vrot.slane %v260_v16, 1  ;;  %v268_v24 = vrot.slane %v267_v17, 1  ;;  %v276_v25 = vrot.slane %v275_v20, 4  ;;  %v283_v26 = vrot.slane %v282_v21, 4 }
  0x4c   : > { %vm768_vm4 = vcmask 662528  }
  0x4d   : > { %v262_v28 = vmax.f32 %v260_v16, %v261_v23  ;;  %v269_v29 = vmax.f32 %v267_v17, %v268_v24  ;;  %v277_v30 = vadd.f32 %v276_v25, %v275_v20  ;;  %v284_v31 = vadd.f32 %v283_v26, %v282_v21 }
  0x4f   : > { %v278_v32 = vrot.slane %v277_v30, 2  ;;  %v285_v33 = vrot.slane %v284_v31, 2  ;;  %v303_v34 = vrot.slane %v269_v29, 7 }
  0x51   : > { %v279_v37 = vadd.f32 %v278_v32, %v277_v30  ;;  %v286_v38 = vadd.f32 %v285_v33, %v284_v31  ;;  %v305_v39 = vsel %vm304_vm2, %v262_v28, %v303_v34 }
  0x52   : > { %312 = vst.msk [vmem:[#allocation2 + $0x2] ss:$2 sm:$0x3] %vm2205_vm3, %v305_v39 }
  0x53   : > { %v280_v40 = vrot.slane %v279_v37, 1  ;;  %v287_v41 = vrot.slane %v286_v38, 1 }
  0x55   : > { %v281_v43 = vadd.f32 %v280_v40, %v279_v37  ;;  %v288_v44 = vadd.f32 %v287_v41, %v286_v38 }
  0x57   : > { %v296_v45 = vmul.f32 %v295_v42, %v281_v43  ;;  %v297_v46 = vmul.f32 %v295_v42, %v288_v44  ;;  %v676_v43 = vstv %s2292_s27  ;;  %s2341_s27 = sld [smem:[#allocation4 + $0x23]] }
  0x59   : > { %v315_v47 = vrot.slane %v297_v46, 7 }
  0x5b   : > { %v316_v48 = vsel %vm304_vm2, %v296_v45, %v315_v47 }
  0x5c   : > { %319 = vst.msk [vmem:[#allocation2 + $0x3] ss:$2 sm:$0x3] %vm2205_vm3, %v316_v48  ;;  %vm392_vm3 = vcmask 654336  }
  0x63   : > { %v2215_v49 = vld [vmem:[#allocation2] sm:$0xff] }
  0x64   : > { %557 = vrot.lane.b32.xlu0 %v2215_v49, %s2025_s22  ;;  %399 = vrot.lane.b32.xlu1 %v2215_v49, %s2026_s26  ;;  %s1611_s22 = sld [smem:[#allocation4 + $0x3f]]  ;;  %v344_v51 = vmul.f32 %v343_v50, %v2215_v49  ;;  %v341_v53 = vmul.f32 %v340_v52, %v2215_v49  ;;  %v382_v58 = vmul.f32 %v381_v55, %v2215_v49  ;;  %v851_v52 = vrot.slane %v2215_v49, 2 }
  0x65   : > { %425 = vrot.lane.b32.xlu2 %v2215_v49, %s2027_s28  ;;  %s1613_s26 = sld [smem:[#allocation4 + $0x15]]  ;;  %v524_v25 = vmul.f32 %v523_v18, %v2215_v49  ;;  %v677_v50 = vmul.f32 %v676_v43, %v2215_v49 }
  0x66   : > { %s1610_s28 = sld [smem:[#allocation4 + $0xe]]  ;;  %v1609_v54 = vrot.slane %v344_v51, 9  ;;  %v1615_v63 = vrot.slane %v382_v58, 9 }
  0x67   : > { %v1633_v32 = vrot.slane %v524_v25, 9 }
  0x68   : > { %v349_v57 = vadd.f32 %v1609_v54, %v341_v53 }
  0x6a   : > { %v362_v56 = vstv %s1611_s22  ;;  %s1629_s22 = sld [smem:[#allocation4 + $0x39]] }
  0x6b   : > { %v363_v59 = vmul.f32 %v362_v56, %v2215_v49  ;;  %v378_v60 = vstv %s1613_s26  ;;  %s1671_s26 = sld [smem:[#allocation4 + $0x3b]] }
  0x6c   : > { %608 = vrot.lane.b32.xlu0 %v2215_v49, %s2796_s29  ;;  %450 = vrot.lane.b32.xlu1 %v2215_v49, %s2794_s30  ;;  %v359_v61 = vstv %s1610_s28  ;;  %v379_v62 = vmul.f32 %v378_v60, %v2215_v49  ;;  %s1628_s28 = sld [smem:[#allocation4 + $0x8]]  ;;  %s2046_s29 = smov 94  }
  0x6d   : > { %713 = vrot.lane.b32.xlu2 %v2215_v49, %s2030_s5  ;;  %s2037_s5 = smov 95   ;;  %v360_v0 = vmul.f32 %v359_v61, %v2215_v49  ;;  %v1612_v1 = vrot.slane %v363_v59, 9  ;;  %s2272_s30 = sld [smem:[#allocation4 + $0x11]] }
  0x6e   : > { %v387_v2 = vadd.f32 %v1615_v63, %v379_v62 }
  0x6f   : > { %v368_v3 = vadd.f32 %v1612_v1, %v360_v0 }
  0x70   : > { %v505_v7 = vstv %s1629_s22  ;;  %s2268_s22 = sld [smem:[#allocation4 + $0x16]] }
  0x71   : > { %v817_v10 = vstv %s1671_s26  ;;  %v506_v11 = vmul.f32 %v505_v7, %v2215_v49  ;;  %s2047_s26 = smov 78  }
  0x72   : > { %v502_v12 = vstv %s1628_s28  ;;  %v818_v14 = vmul.f32 %v817_v10, %v2215_v49  ;;  %s2278_s28 = sld [smem:[#allocation4 + $0x41]] }
  0x73   : > { %v503_v16 = vmul.f32 %v502_v12, %v2215_v49  ;;  %v1630_v17 = vrot.slane %v506_v11, 9  ;;  %v832_v30 = vstv %s2272_s30  ;;  %s2308_s30 = sld [smem:[#allocation4 + $0x49]] }
  0x74   : > { %1005 = vrot.lane.b32.xlu0 %v2215_v49, %s2031_s6  ;;  %583 = vrot.lane.b32.xlu1 %v2215_v49, %s2032_s7  ;;  %s2798_s6 = smov 81   ;;  %s2039_s7 = smov 80   ;;  %v1672_v21 = vrot.slane %v818_v14, 9  ;;  %v833_v37 = vmul.f32 %v832_v30, %v2215_v49 }
  0x75   : > { %871 = vrot.lane.b32.xlu2 %v2215_v49, %s2033_s8  ;;  %v511_v23 = vadd.f32 %v1630_v17, %v503_v16 }
  0x76   : > { %v538_v27 = vstv %s2268_s22  ;;  %s2317_s22 = sld [smem:[#allocation4 + $0x17]] }
  0x77   : > { %v539_v33 = vmul.f32 %v538_v27, %v2215_v49 }
  0x78   : > { %v679_v35 = vstv %s2278_s28  ;;  %s2321_s28 = sld [smem:[#allocation4 + $0x18]] }
  0x79   : > { %v680_v40 = vmul.f32 %v679_v35, %v2215_v49  ;;  %v855_v56 = vstv %s2308_s30  ;;  %s1715_s30 = sld [smem:[#allocation4 + $0x13]] }
  0x7a   : > { %v856_v61 = vmul.f32 %v855_v56, %v851_v52 }
  0x7b   : > { %v1654_v51 = vrot.slane %v680_v40, 9 }
  0x7c   : > { %1030 = vrot.lane.b32.xlu0 %v2215_v49, %s2034_s12  ;;  %739 = vrot.lane.b32.xlu1 %v2215_v49, %s2035_s16  ;;  %s1650_s12 = sld [smem:[#allocation4 + $0x3a]]  ;;  %v694_v0 = vstv %s2317_s22 }
  0x7d   : > { %895 = vrot.lane.b32.xlu2 %v2215_v49, %s2036_s24  ;;  %s1649_s16 = sld [smem:[#allocation4 + $0x9]]  ;;  %v685_v62 = vadd.f32 %v1654_v51, %v677_v50 }
  0x7e   : > { %v850_v1 = vstv %s2321_s28  ;;  %s1736_s22 = sld [smem:[#allocation4 + $0x14]] }
  0x7f   : > { %v853_v7 = vmul.f32 %v851_v52, %v850_v1  ;;  %s2368_s28 = sld [smem:[#allocation4 + $0x4d]] }
  0x82   : > { %v661_v4 = vstv %s1650_s12  ;;  %s2260_s12 = sld [smem:[#allocation4 + $0x47]] }
  0x83   : > { %v662_v5 = vmul.f32 %v661_v4, %v2215_v49  ;;  %v658_v6 = vstv %s1649_s16  ;;  %s2263_s16 = sld [smem:[#allocation4 + $0x42]] }
  0x84   : > { %1055 = vrot.lane.b32.xlu0 %v2215_v49, %s2037_s5  ;;  %764 = vrot.lane.b32.xlu1 %v2215_v49, %s2798_s6  ;;  %s2251_s5 = sld [smem:[#allocation4 + $0xa]]  ;;  %v659_v8 = vmul.f32 %v658_v6, %v2215_v49  ;;  %s2048_s6 = smov 93   ;;  %v1308_v40 = vstv %s1736_s22 }
  0x85   : > { %919 = vrot.lane.b32.xlu2 %v2215_v49, %s2039_s7  ;;  %v1651_v9 = vrot.slane %v662_v5, 9  ;;  %v695_v5 = vmul.f32 %v694_v0, %v2215_v49  ;;  %s2402_s22 = sld [smem:[#allocation4 + $0x55]] }
  0x87   : > { %v667_v13 = vadd.f32 %v1651_v9, %v659_v8  ;;  %v1678_v8 = vrot.slane %v856_v61, 9 }
  0x88   : > { %v541_v19 = vstv %s2260_s12  ;;  %s2295_s12 = sld [smem:[#allocation4 + $0xb]] }
  0x89   : > { %v835_v22 = vstv %s2263_s16  ;;  %v542_v26 = vmul.f32 %v541_v19, %v2215_v49  ;;  %s2299_s16 = sld [smem:[#allocation4 + $0xc]]  ;;  %v861_v14 = vadd.f32 %v1678_v8, %v853_v7  ;;  %v424_v19 = vstv %s2341_s27 }
  0x8a   : > { %v814_v15 = vstv %s2251_s5  ;;  %s2283_s5 = sld [smem:[#allocation4 + $0x3c]]  ;;  %v836_v29 = vmul.f32 %v835_v22, %v2215_v49 }
  0x8b   : > { %v815_v20 = vmul.f32 %v814_v15, %v2215_v49  ;;  %v1636_v34 = vrot.slane %v542_v26, 9  ;;  %s2379_s27 = sld [smem:[#allocation4 + $0x5b]] }
  0x8c   : > { %1166 = vrot.lane.b32.xlu1 %v2215_v49, %s2040_s9  ;;  %351 = vrot.lane.b32.xlu0 %v349_v57, %s2033_s8  ;;  %s2043_s9 = smov 110   ;;  %v1675_v38 = vrot.slane %v836_v29, 9 }
  0x8d   : > { %1327 = vrot.lane.b32.xlu2 %v2215_v49, %s2041_s11  ;;  %s2044_s11 = smov 79   ;;  %v823_v28 = vadd.f32 %v1672_v21, %v815_v20  ;;  %v547_v42 = vadd.f32 %v1636_v34, %v539_v33  ;;  %v1147_v33 = vstv %s1715_s30  ;;  %s2392_s30 = sld [smem:[#allocation4 + $0x2a]] }
  0x8e   : > { %v968_v45 = vstv %s2295_s12  ;;  %v841_v46 = vadd.f32 %v1675_v38, %v833_v37  ;;  %s1620_s12 = sld [smem:[#allocation4 + $0x54]]  ;;  %v1148_v34 = vmul.f32 %v1147_v33, %v2215_v49 }
  0x8f   : > { %v1129_v48 = vstv %s2299_s16  ;;  %v969_v53 = vmul.f32 %v968_v45, %v2215_v49  ;;  %s2345_s16 = sld [smem:[#allocation4 + $0x12]]  ;;  %v408_v45 = vstv %s2368_s28 }
  0x90   : > { %v971_v36 = vstv %s2283_s5  ;;  %s2326_s5 = sld [smem:[#allocation4 + $0xd]]  ;;  %v1130_v57 = vmul.f32 %v1129_v48, %v2215_v49 }
  0x91   : > { %v972_v44 = vmul.f32 %v971_v36, %v2215_v49  ;;  %s2405_s28 = sld [smem:[#allocation4 + $0x19]] }
  0x93   : > { %v1693_v54 = vrot.slane %v972_v44, 9 }
  0x94   : > { %389 = vrot.lane.b32.xlu1 %v387_v2, %s2039_s7  ;;  %370 = vrot.lane.b32.xlu0 %v368_v3, %s2036_s24  ;;  %v434_v17 = vstv %s1620_s12  ;;  %s2383_s12 = sld [smem:[#allocation4 + $0x2b]] }
  0x95   : > { %1352 = vrot.lane.b32.xlu2 %v2215_v49, %s2042_s21  ;;  %s2045_s21 = smov 77   ;;  %v977_v63 = vadd.f32 %v1693_v54, %v969_v53  ;;  %v986_v20 = vstv %s2345_s16  ;;  %s2385_s16 = sld [smem:[#allocation4 + $0x5c]] }
  0x96   : > { %v1290_v4 = vstv %s2326_s5  ;;  %v987_v25 = vmul.f32 %v986_v20, %v2215_v49  ;;  %s2372_s5 = sld [smem:[#allocation4 + $0x4e]] }
  0x97   : > { %v1291_v10 = vmul.f32 %v1290_v4, %v2215_v49 }
  0x9b   : > { %v617_v4 = vstv %s2385_s16  ;;  %s2442_s16 = sld [smem:[#allocation4 + $0x51]] }
  0x9c   : > { %1191 = vrot.lane.b32.xlu1 %v2215_v49, %s2043_s9  ;;  %1080 = vrot.lane.b32.xlu0 %v2215_v49, %s2044_s11  ;;  %s2266_s9 = sld [smem:[#allocation4 + $0xf]] }
  0x9d   : > { %1402 = vrot.lane.b32.xlu2 %v2215_v49, %s2045_s21 }
  0xa2   : > { %v520_v24 = vstv %s2266_s9  ;;  %s2302_s9 = sld [smem:[#allocation4 + $0x48]] }
  0xa3   : > { %v521_v31 = vmul.f32 %v520_v24, %v2215_v49 }
  0xa4   : > { %1216 = vrot.lane.b32.xlu1 %v2215_v49, %s2046_s29  ;;  %1241 = vrot.lane.b32.xlu0 %v2215_v49, %s2047_s26  ;;  %s2287_s29 = sld [smem:[#allocation4 + $0x3d]] }
  0xa5   : > { %669 = vrot.lane.b32.xlu2 %v667_v13, %s2033_s8  ;;  %v529_v41 = vadd.f32 %v1633_v32, %v521_v31 }
  0xa8   : > { %v697_v55 = vstv %s2302_s9  ;;  %s1716_s9 = sld [smem:[#allocation4 + $0x44]] }
  0xa9   : > { %v698_v60 = vmul.f32 %v697_v55, %v2215_v49 }
  0xaa   : > { %v1132_v39 = vstv %s2287_s29  ;;  %s2337_s29 = sld [smem:[#allocation4 + $0x43]] }
  0xab   : > { %v1133_v47 = vmul.f32 %v1132_v39, %v2215_v49  ;;  %v1657_v6 = vrot.slane %v698_v60, 9 }
  0xac   : > { %1377 = vrot.lane.b32.xlu1 %v2215_v49, %s2048_s6  ;;  %513 = vrot.lane.b32.xlu0 %v511_v23, %s2033_s8  ;;  %s2314_s6 = sld [smem:[#allocation4 + $0x3e]] }
  0xad   : > { %825 = vrot.lane.b32.xlu2 %v823_v28, %s2033_s8  ;;  %v1714_v58 = vrot.slane %v1133_v47, 9  ;;  %v703_v13 = vadd.f32 %v1657_v6, %v695_v5  ;;  %v566_v47 = vstv %s2372_s5  ;;  %s2413_s5 = sld [smem:[#allocation4 + $0x50]] }
  0xae   : > { %v1150_v28 = vstv %s1716_s9  ;;  %s2390_s9 = sld [smem:[#allocation4 + $0x4f]] }
  0xaf   : > { %v1138_v2 = vadd.f32 %v1714_v58, %v1130_v57  ;;  %v1151_v32 = vmul.f32 %v1150_v28, %v2215_v49 }
  0xb0   : > { %v989_v9 = vstv %s2337_s29  ;;  %s2377_s29 = sld [smem:[#allocation4 + $0x1c]] }
  0xb1   : > { %v990_v18 = vmul.f32 %v989_v9, %v2215_v49  ;;  %v1717_v35 = vrot.slane %v1151_v32, 9  ;;  %v1004_v32 = vstv %s2405_s28  ;;  %s2807_s28 = smov 81  }
  0xb2   : > { %v1293_v59 = vstv %s2314_s6  ;;  %s1737_s6 = sld [smem:[#allocation4 + $0x45]] }
  0xb3   : > { %v1294_v3 = vmul.f32 %v1293_v59, %v2215_v49  ;;  %v1696_v26 = vrot.slane %v990_v18, 9  ;;  %v1156_v38 = vadd.f32 %v1717_v35, %v1148_v34 }
  0xb4   : > { %531 = vrot.lane.b32.xlu1 %v529_v41, %s2036_s24  ;;  %549 = vrot.lane.b32.xlu0 %v547_v42, %s2039_s7  ;;  %v1309_v41 = vmul.f32 %v1308_v40, %v2215_v49 }
  0xb5   : > { %843 = vrot.lane.b32.xlu2 %v841_v46, %s2036_s24  ;;  %v1735_v11 = vrot.slane %v1294_v3, 9  ;;  %v995_v31 = vadd.f32 %v1696_v26, %v987_v25  ;;  %v607_v3 = vstv %s2383_s12  ;;  %s2436_s12 = sld [smem:[#allocation4 + $0x25]] }
  0xb6   : > { %v397_v58 = vstv %s2377_s29  ;;  %s2427_s29 = sld [smem:[#allocation4 + $0x1f]] }
  0xb7   : > { %v1299_v21 = vadd.f32 %v1735_v11, %v1291_v10  ;;  %v722_v10 = vstv %s2390_s9  ;;  %s2447_s9 = sld [smem:[#allocation4 + $0x57]] }
  0xb8   : > { %v1311_v36 = vstv %s1737_s6  ;;  %s2396_s6 = sld [smem:[#allocation4 + $0x1e]] }
  0xb9   : > { %v1312_v39 = vmul.f32 %v1311_v36, %v2215_v49 }
  0xbb   : > { %v1738_v42 = vrot.slane %v1312_v39, 9  ;;  %v879_v39 = vstv %s2413_s5  ;;  %s2483_s5 = sld [smem:[#allocation4 + $0x4b]] }
  0xbc   : > { %687 = vrot.lane.b32.xlu1 %v685_v62, %s2036_s24  ;;  %979 = vrot.lane.b32.xlu0 %v977_v63, %s2033_s8 }
  0xbd   : > { %1140 = vrot.lane.b32.xlu2 %v1138_v2, %s2033_s8  ;;  %v1317_v54 = vadd.f32 %v1738_v42, %v1309_v41  ;;  %v459_v2 = vstv %s2379_s27  ;;  %s2432_s27 = sld [smem:[#allocation4 + $0x56]] }
  0xbf   : > { %v426_v12 = vpop.permute.xlu2 %425 }
  0xc0   : > { %v427_v15 = vrot.slane %v426_v12, 2  ;;  %v428_v16 = vrot.slane %v426_v12, 4 }
  0xc2   : > { %v430_v22 = vsel %vm429_vm5, %v427_v15, %v428_v16  ;;  %v449_v16 = vstv %s2392_s30  ;;  %s2455_s30 = sld [smem:[#allocation4 + $0x26]]  ;;  %vm1331_vm5 = vcmask 1022976  }
  0xc3   : > { %v435_v23 = vmul.f32 %v434_v17, %v430_v22  ;;  %v432_v24 = vmul.f32 %v430_v22, %v424_v19  ;;  %v712_v17 = vstv %s2396_s6  ;;  %s2457_s6 = sld [smem:[#allocation4 + $0x5d]] }
  0xc4   : > { %705 = vrot.lane.b32.xlu1 %v703_v13, %s2039_s7  ;;  %863 = vrot.lane.b32.xlu0 %v861_v14, %s2039_s7 }
  0xc5   : > { %v1621_v27 = vrot.slane %v435_v23, 9  ;;  %1301 = vrot.lane.b32.xlu2 %v1299_v21, %s2033_s8  ;;  %s2370_s8 = sld [smem:[#allocation4 + $0x1d]] }
  0xc7   : > { %v2362_v29 = vpop.permute.xlu2 %713  ;;  %v440_v30 = vadd.f32 %v1621_v27, %v432_v24 }
  0xc8   : > { %v715_v57 = vrot.slane %v2362_v29, 2  ;;  %v716_v59 = vrot.slane %v2362_v29, 4  ;;  %v592_v29 = vstv %s2402_s22  ;;  %s2461_s22 = sld [smem:[#allocation4 + $0x5e]] }
  0xca   : > { %v718_v5 = vsel %vm717_vm8, %v715_v57, %v716_v59  ;;  %vm1356_vm8 = vcmask 891904  }
  0xcb   : > { %v556_v46 = vstv %s2370_s8  ;;  %s2410_s8 = sld [smem:[#allocation4 + $0x4a]]  ;;  %v723_v21 = vmul.f32 %v722_v10, %v718_v5 }
  0xcc   : > { %442 = vrot.lane.b32.xlu0 %v440_v30, %s2045_s21  ;;  %997 = vrot.lane.b32.xlu1 %v995_v31, %s2036_s24  ;;  %v720_v30 = vmul.f32 %v718_v5, %v712_v17 }
  0xcd   : > { %v1660_v31 = vrot.slane %v723_v21, 9 }
  0xcf   : > { %v2374_v37 = vpop.permute.xlu2 %871 }
  0xd0   : > { %v873_v20 = vrot.slane %v2374_v37, 2  ;;  %v874_v22 = vrot.slane %v2374_v37, 4 }
  0xd1   : > { %v1014_v33 = vstv %s2410_s8  ;;  %s2472_s8 = sld [smem:[#allocation4 + $0x2c]] }
  0xd2   : > { %v875_v34 = vsel %vm354_vm11, %v873_v20, %v874_v22 }
  0xd4   : > { %1158 = vrot.lane.b32.xlu1 %v1156_v38, %s2036_s24 }
  0xd6   : > { %v558_v43 = vpop.permute.xlu0 %557  ;;  %v400_v44 = vpop.permute.xlu1 %399 }
  0xd7   : > { %v559_v48 = vrot.slane %v558_v43, 2  ;;  %v560_v50 = vrot.slane %v558_v43, 4  ;;  %v401_v51 = vrot.slane %v400_v44, 2  ;;  %v402_v52 = vrot.slane %v400_v44, 4  ;;  %v2394_v53 = vpop.permute.xlu2 %895 }
  0xd8   : > { %v898_v57 = vrot.slane %v2394_v53, 4 }
  0xd9   : > { %v562_v55 = vsel %vm561_vm6, %v559_v48, %v560_v50  ;;  %v404_v56 = vsel %vm403_vm7, %v401_v51, %v402_v52  ;;  %v880_v52 = vmul.f32 %v879_v39, %v875_v34  ;;  %vm1170_vm6 = vcmask 1031168  }
  0xda   : > { %v409_v60 = vmul.f32 %v408_v45, %v404_v56  ;;  %v564_v61 = vmul.f32 %v562_v55, %v556_v46  ;;  %v567_v62 = vmul.f32 %v566_v47, %v562_v55  ;;  %v406_v63 = vmul.f32 %v404_v56, %v397_v58 }
  0xdb   : > { %v728_v55 = vadd.f32 %v1660_v31, %v720_v30  ;;  %v870_v56 = vstv %s2427_s29  ;;  %v927_v31 = vstv %s2461_s22  ;;  %s2493_s29 = sld [smem:[#allocation4 + $0x4c]]  ;;  %vm1059_vm7 = vcmask 777216  }
  0xdc   : > { %v1618_v0 = vrot.slane %v409_v60, 9  ;;  %v1639_v1 = vrot.slane %v567_v62, 9  ;;  %1319 = vrot.lane.b32.xlu1 %v1317_v54, %s2036_s24  ;;  %s2424_s24 = sld [smem:[#allocation4 + $0x24]]  ;;  %v897_v54 = vrot.slane %v2394_v53, 2 }
  0xdd   : > { %s2536_s22 = sld [smem:[#allocation4 + $0x2e]] }
  0xde   : > { %v609_v6 = vpop.permute.xlu0 %608  ;;  %v451_v7 = vpop.permute.xlu1 %450  ;;  %v414_v8 = vadd.f32 %v1618_v0, %v406_v63  ;;  %v572_v9 = vadd.f32 %v1639_v1, %v564_v61  ;;  %v748_v61 = vstv %s2432_s27  ;;  %s2497_s27 = sld [smem:[#allocation4 + $0x34]] }
  0xdf   : > { %v610_v11 = vrot.slane %v609_v6, 2  ;;  %v611_v12 = vrot.slane %v609_v6, 4  ;;  %v452_v13 = vrot.slane %v451_v7, 2  ;;  %v453_v14 = vrot.slane %v451_v7, 4  ;;  %v2415_v15 = vpop.permute.xlu2 %919 }
  0xe0   : > { %416 = vrot.lane.b32.xlu2 %v414_v8, %s2045_s21  ;;  %574 = vrot.lane.b32.xlu0 %v572_v9, %s2047_s26  ;;  %v899_v8 = vsel %vm373_vm14, %v897_v54, %v898_v57  ;;  %v738_v9 = vstv %s2436_s12  ;;  %v922_v17 = vrot.slane %v2415_v15, 4  ;;  %s2499_s12 = sld [smem:[#allocation4 + $0x58]] }
  0xe1   : > { %v613_v18 = vsel %vm612_vm9, %v610_v11, %v611_v12  ;;  %v455_v19 = vsel %vm454_vm10, %v452_v13, %v453_v14  ;;  %v1039_v12 = vstv %s2442_s16  ;;  %v903_v13 = vstv %s2447_s9  ;;  %s2502_s16 = sld [smem:[#allocation4 + $0x1b]] }
  0xe2   : > { %v460_v23 = vmul.f32 %v459_v2, %v455_v19  ;;  %v615_v24 = vmul.f32 %v613_v18, %v607_v3  ;;  %v618_v25 = vmul.f32 %v617_v4, %v613_v18  ;;  %v457_v26 = vmul.f32 %v455_v19, %v449_v16  ;;  %s2506_s9 = sld [smem:[#allocation4 + $0x3]] }
  0xe3   : > { %v582_v47 = vstv %s2424_s24  ;;  %v877_v2 = vmul.f32 %v875_v34, %v870_v56  ;;  %v1681_v3 = vrot.slane %v880_v52, 9  ;;  %v921_v16 = vrot.slane %v2415_v15, 2  ;;  %s2487_s24 = sld [smem:[#allocation4 + $0x1a]] }
  0xe4   : > { %v1624_v27 = vrot.slane %v460_v23, 9  ;;  %v1645_v28 = vrot.slane %v618_v25, 9  ;;  %v904_v22 = vmul.f32 %v903_v13, %v899_v8  ;;  %v1175_v56 = vstv %s2483_s5  ;;  %s2808_s5 = smov 82  }
  0xe5   : > { %v885_v18 = vadd.f32 %v1681_v3, %v877_v2  ;;  %v923_v15 = vsel %vm392_vm3, %v921_v16, %v922_v17 }
  0xe6   : > { %v1006_v35 = vpop.permute.xlu0 %1005  ;;  %v584_v36 = vpop.permute.xlu1 %583  ;;  %v465_v37 = vadd.f32 %v1624_v27, %v457_v26  ;;  %v623_v38 = vadd.f32 %v1645_v28, %v615_v24  ;;  %v894_v24 = vstv %s2455_s30  ;;  %v773_v28 = vstv %s2457_s6  ;;  %s2517_s30 = sld [smem:[#allocation4 + $0x53]] }
  0xe7   : > { %v1007_v40 = vrot.slane %v1006_v35, 2  ;;  %v1008_v41 = vrot.slane %v1006_v35, 4  ;;  %v585_v42 = vrot.slane %v584_v36, 2  ;;  %v586_v43 = vrot.slane %v584_v36, 4  ;;  %v2438_v44 = vpop.permute.xlu2 %1327  ;;  %s2528_s6 = sld [smem:[#allocation4 + $0x22]] }
  0xe8   : > { %467 = vrot.lane.b32.xlu2 %v465_v37, %s2045_s21  ;;  %625 = vrot.lane.b32.xlu0 %v623_v38, %s2047_s26  ;;  %s2452_s21 = sld [smem:[#allocation4 + $0x20]]  ;;  %v901_v35 = vmul.f32 %v899_v8, %v894_v24  ;;  %v1684_v36 = vrot.slane %v904_v22, 9  ;;  %v763_v38 = vstv %s2472_s8  ;;  %v1064_v3 = vstv %s2499_s12 }
  0xe9   : > { %v1010_v45 = vsel %vm1009_vm12, %v1007_v40, %v1008_v41  ;;  %v588_v46 = vsel %vm587_vm13, %v585_v42, %v586_v43  ;;  %v928_v40 = vmul.f32 %v927_v31, %v923_v15  ;;  %v803_v13 = vstv %s2506_s9  ;;  %s2543_s8 = sld [smem:[#allocation4 + $0x5f]] }
  0xea   : > { %v593_v48 = vmul.f32 %v592_v29, %v588_v46  ;;  %v1012_v50 = vmul.f32 %v1010_v45, %v1004_v32  ;;  %v1015_v51 = vmul.f32 %v1014_v33, %v1010_v45  ;;  %v590_v58 = vmul.f32 %v588_v46, %v582_v47  ;;  %s2568_s12 = sld [smem:[#allocation4 + $0x2f]] }
  0xeb   : > { %v909_v43 = vadd.f32 %v1684_v36, %v901_v35  ;;  %v1329_v47 = vrot.slane %v2438_v44, 2  ;;  %v804_v24 = vmul.f32 %v803_v13, %v2215_v49  ;;  %vm419_vm12 = vcmask 629760   ;;  %s2577_s9 = sld [smem:[#allocation4 + $0x28]] }
  0xec   : > { %v1642_v59 = vrot.slane %v593_v48, 9  ;;  %v1699_v60 = vrot.slane %v1015_v51, 9  ;;  %v1330_v48 = vrot.slane %v2438_v44, 4  ;;  %vm1195_vm13 = vcmask 900096  }
  0xee   : > { %v1031_v62 = vpop.permute.xlu0 %1030  ;;  %v740_v63 = vpop.permute.xlu1 %739  ;;  %v598_v0 = vadd.f32 %v1642_v59, %v590_v58  ;;  %v1020_v1 = vadd.f32 %v1699_v60, %v1012_v50  ;;  %v1029_v23 = vstv %s2452_s21  ;;  %s2511_s21 = sld [smem:[#allocation4 + $0x27]] }
  0xef   : > { %v1032_v53 = vrot.slane %v1031_v62, 2  ;;  %v1033_v4 = vrot.slane %v1031_v62, 4  ;;  %v741_v5 = vrot.slane %v740_v63, 2  ;;  %v742_v6 = vrot.slane %v740_v63, 4  ;;  %v2459_v7 = vpop.permute.xlu2 %1352 }
  0xf0   : > { %730 = vrot.lane.b32.xlu2 %v728_v55, %s2044_s11  ;;  %600 = vrot.lane.b32.xlu1 %v598_v0, %s2047_s26  ;;  %s2476_s26 = sld [smem:[#allocation4 + $0x2d]]  ;;  %v1687_v55 = vrot.slane %v928_v40, 9  ;;  %v1332_v62 = vsel %vm1331_vm5, %v1329_v47, %v1330_v48  ;;  %v1336_v0 = vstv %s2493_s29  ;;  %vm577_vm5 = vcmask 637952  }
  0xf1   : > { %v1035_v10 = vsel %vm1034_vm15, %v1032_v53, %v1033_v4  ;;  %v744_v11 = vsel %vm743_vm0, %v741_v5, %v742_v6  ;;  %1022 = vrot.lane.b32.xlu0 %v1020_v1, %s2807_s28  ;;  %v806_v1 = vstv %s2497_s27  ;;  %v1354_v4 = vrot.slane %v2459_v7, 2  ;;  %s2560_s29 = sld [smem:[#allocation4 + $0x60]] }
  0xf2   : > { %v749_v14 = vmul.f32 %v748_v61, %v744_v11  ;;  %v746_v19 = vmul.f32 %v744_v11, %v738_v9  ;;  %v1040_v21 = vmul.f32 %v1039_v12, %v1035_v10  ;;  %v1037_v33 = vmul.f32 %v1035_v10, %v1029_v23  ;;  %s2564_s27 = sld [smem:[#allocation4 + $0x30]] }
  0xf3   : > { %v1165_v61 = vstv %s2487_s24  ;;  %v1355_v5 = vrot.slane %v2459_v7, 4  ;;  %v1337_v10 = vmul.f32 %v1336_v0, %v1332_v62  ;;  %v807_v11 = vmul.f32 %v806_v1, %v2215_v49  ;;  %s2553_s24 = sld [smem:[#allocation4 + $0x21]] }
  0xf4   : > { %v1663_v20 = vrot.slane %v749_v14, 9  ;;  %v1702_v34 = vrot.slane %v1040_v21, 9  ;;  %v1326_v12 = vstv %s2502_s16  ;;  %vm733_vm15 = vcmask 646144   ;;  %s2809_s16 = smov 83  }
  0xf5   : > { %v1334_v22 = vmul.f32 %v1332_v62, %v1326_v12  ;;  %v1741_v23 = vrot.slane %v1337_v10, 9  ;;  %vm1220_vm0 = vcmask 769024   ;;  %v1240_v10 = vstv %s2568_s12  ;;  %s2694_s12 = sld [smem:[#allocation4 + $0x5]] }
  0xf6   : > { %v2480_v25 = vpop.permute.xlu0 %1055  ;;  %v765_v26 = vpop.permute.xlu1 %764  ;;  %v754_v27 = vadd.f32 %v1663_v20, %v746_v19  ;;  %v918_v41 = vstv %s2476_s26  ;;  %v1045_v42 = vadd.f32 %v1702_v34, %v1037_v33  ;;  %v1054_v19 = vstv %s2511_s21  ;;  %s2550_s26 = sld [smem:[#allocation4 + $0x61]] }
  0xf7   : > { %v766_v29 = vrot.slane %v765_v26, 2  ;;  %v767_v30 = vrot.slane %v765_v26, 4  ;;  %v2489_v32 = vpop.permute.xlu2 %1402  ;;  %v925_v54 = vmul.f32 %v923_v15, %v918_v41  ;;  %v1057_v57 = vrot.slane %v2480_v25, 2  ;;  %s2586_s21 = sld [smem:[#allocation4 + $0x5a]] }
  0xf8   : > { %887 = vrot.lane.b32.xlu2 %v885_v18, %s2039_s7  ;;  %756 = vrot.lane.b32.xlu1 %v754_v27, %s2044_s11  ;;  %v1058_v58 = vrot.slane %v2480_v25, 4  ;;  %v1357_v18 = vsel %vm1356_vm8, %v1354_v4, %v1355_v5  ;;  %v1361_v20 = vstv %s2517_s30  ;;  %v1669_v25 = vrot.slane %v807_v11, 9  ;;  %s1745_s30 = sld [smem:[#allocation4 + $0x29]] }
  0xf9   : > { %v769_v37 = vsel %vm768_vm4, %v766_v29, %v767_v30  ;;  %v933_v6 = vadd.f32 %v1687_v55, %v925_v54  ;;  %v1351_v15 = vstv %s2528_s6  ;;  %v1362_v29 = vmul.f32 %v1361_v20, %v1357_v18  ;;  %s328_s6 = sld [smem:[#allocation4]] }
  0xfa   : > { %v774_v39 = vmul.f32 %v773_v28, %v769_v37  ;;  %v771_v45 = vmul.f32 %v769_v37, %v763_v38  ;;  %v1060_v53 = vsel %vm1059_vm7, %v1057_v57, %v1058_v58  ;;  %v1404_v49 = vrot.slane %v2489_v32, 2 }
  0xfb   : > { %v1065_v7 = vmul.f32 %v1064_v3, %v1060_v53  ;;  %v1062_v27 = vmul.f32 %v1060_v53, %v1054_v19  ;;  %v1405_v30 = vrot.slane %v2489_v32, 4  ;;  %v1342_v31 = vadd.f32 %v1741_v23, %v1334_v22 }
  0xfc   : > { %v1666_v46 = vrot.slane %v774_v39, 9  ;;  %v812_v33 = vadd.f32 %v1669_v25, %v804_v24  ;;  %v1359_v34 = vmul.f32 %v1357_v18, %v1351_v15  ;;  %v1744_v40 = vrot.slane %v1362_v29, 9 }
  0xfd   : > { %v1705_v28 = vrot.slane %v1065_v7, 9  ;;  %v1079_v41 = vstv %s2536_s22  ;;  %v1406_v48 = vsel %vm419_vm12, %v1404_v49, %v1405_v30  ;;  %v1410_v54 = vstv %s2550_s26  ;;  %s1625_s22 = sld [smem:[#allocation4 + $0x1]] }
  0xfe   : > { %v1167_v50 = vpop.permute.xlu1 %1166  ;;  %v2508_v51 = vpop.permute.xlu0 %351  ;;  %v779_v52 = vadd.f32 %v1666_v46, %v771_v45  ;;  %v1190_v57 = vstv %s2553_s24  ;;  %v1401_v4 = vstv %s2564_s27  ;;  %v1249_v11 = vstv %s2560_s29  ;;  %s1647_s26 = sld [smem:[#allocation4 + $0x33]]  ;;  %s2050_s29 = smov 50  }
  0xff   : > { %v1168_v44 = vrot.slane %v1167_v50, 2  ;;  %v1169_v59 = vrot.slane %v1167_v50, 4  ;;  %v2515_v60 = vpop.permute.xlu2 %669  ;;  %v1070_v39 = vadd.f32 %v1705_v28, %v1062_v27  ;;  %v1408_v18 = vmul.f32 %v1406_v48, %v1401_v4  ;;  %s2666_s24 = sld [smem:[#allocation4 + $0x35]] }
 0x100   : > { %1047 = vrot.lane.b32.xlu2 %v1045_v42, %s2807_s28  ;;  %911 = vrot.lane.b32.xlu1 %v909_v43, %s2039_s7  ;;  %v1088_v42 = vstv %s2543_s8  ;;  %v1215_v22 = vstv %s2577_s9  ;;  %vm478_vm7 = vcmask 1042434   ;;  %vm480_vm8 = vcmask 1041408   ;;  %s2049_s8 = smov 51   ;;  %s2687_s27 = sld [smem:[#allocation4 + $0x36]] }
 0x101   : > { %v1171_v63 = vsel %vm1170_vm6, %v1168_v44, %v1169_v59  ;;  %781 = vrot.lane.b32.xlu0 %v779_v52, %s2044_s11  ;;  %s2532_s11 = sld [smem:[#allocation4 + $0x52]]  ;;  %vm1381_vm6 = vcmask 760832   ;;  %s2051_s9 = smov 49  }
 0x102   : > { %v1176_v2 = vmul.f32 %v1175_v56, %v1171_v63  ;;  %v1173_v8 = vmul.f32 %v1171_v63, %v1165_v61  ;;  %v1367_v61 = vadd.f32 %v1744_v40, %v1359_v34  ;;  %v1411_v63 = vmul.f32 %v1410_v54, %v1406_v48 }
 0x103   : > { %v329_v48 = vstv %s328_s6  ;;  %s2054_s6 = smov 46  }
 0x104   : > { %v1720_v9 = vrot.slane %v1176_v2, 9  ;;  %v1750_v19 = vrot.slane %v1411_v63, 9 }
 0x106   : > { %v2539_v14 = vpop.permute.xlu1 %389  ;;  %v2541_v16 = vpop.permute.xlu0 %370  ;;  %v1181_v17 = vadd.f32 %v1720_v9, %v1173_v8  ;;  %v1416_v15 = vadd.f32 %v1750_v19, %v1408_v18 }
 0x107   : > { %v826_v21 = vpop.permute.xlu2 %825  ;;  %v1200_v35 = vstv %s2532_s11  ;;  %s1626_s11 = sld [smem:[#allocation4 + $0x32]] }
 0x108   : > { %935 = vrot.lane.b32.xlu2 %v933_v6, %s2039_s7  ;;  %v827_v26 = vrot.slane %v826_v21, 2  ;;  %s2556_s7 = sld [smem:[#allocation4 + $0x59]] }
 0x109   : > { %1183 = vrot.lane.b32.xlu0 %v1181_v17, %s2808_s5 }
 0x10a   : > { %v828_v36 = vsel %vm354_vm11, %v826_v21, %v827_v26 }
 0x10b   : > { %v830_v50 = vadd.f32 %v828_v36, %v812_v33 }
 0x10e   : > { %v1192_v37 = vpop.permute.xlu1 %1191  ;;  %v1081_v38 = vpop.permute.xlu0 %1080  ;;  %v1225_v53 = vstv %s2556_s7  ;;  %s2672_s7 = sld [smem:[#allocation4 + $0x4]] }
 0x10f   : > { %v1193_v32 = vrot.slane %v1192_v37, 2  ;;  %v1194_v43 = vrot.slane %v1192_v37, 4  ;;  %v1082_v45 = vrot.slane %v1081_v38, 2  ;;  %v1083_v46 = vrot.slane %v1081_v38, 4  ;;  %v844_v47 = vpop.permute.xlu2 %843 }
 0x110   : > { %1344 = vrot.lane.b32.xlu2 %v1342_v31, %s2809_s16  ;;  %v845_v52 = vrot.slane %v844_v47, 2  ;;  %v1376_v37 = vstv %s1745_s30  ;;  %s1730_s30 = sld [smem:[#allocation4 + $0x6]] }
 0x111   : > { %v1196_v55 = vsel %vm1195_vm13, %v1193_v32, %v1194_v43  ;;  %v1084_v56 = vsel %vm733_vm15, %v1082_v45, %v1083_v46  ;;  %1072 = vrot.lane.b32.xlu0 %v1070_v39, %s2807_s28  ;;  %v2607_v46 = vld [vmem:[#allocation2] sm:$0xff] }
 0x112   : > { %v1201_v58 = vmul.f32 %v1200_v35, %v1196_v55  ;;  %v1086_v44 = vmul.f32 %v1084_v56, %v1079_v41  ;;  %v1089_v59 = vmul.f32 %v1088_v42, %v1084_v56  ;;  %v846_v62 = vsel %vm373_vm14, %v844_v47, %v845_v52 }
 0x113   : > { %v1198_v0 = vmul.f32 %v1196_v55, %v1190_v57  ;;  %v2580_v3 = vadd.f32 %v846_v62, %v830_v50  ;;  %v1386_v35 = vstv %s2586_s21  ;;  %v330_v52 = vmul.f32 %v2607_v46, %v329_v48  ;;  %s2052_s21 = smov 48  }
 0x114   : > { %v1723_v1 = vrot.slane %v1201_v58, 9  ;;  %v1708_v2 = vrot.slane %v1089_v59, 9  ;;  %v353_v56 = vrot.slane %v2508_v51, 2  ;;  %v372_v59 = vrot.slane %v2541_v16, 2 }
 0x116   : > { %v1217_v5 = vpop.permute.xlu1 %1216  ;;  %v1242_v6 = vpop.permute.xlu0 %1241  ;;  %v1206_v8 = vadd.f32 %v1723_v1, %v1198_v0  ;;  %v1094_v9 = vadd.f32 %v1708_v2, %v1086_v44  ;;  %v355_v44 = vsel %vm354_vm11, %v2508_v51, %v353_v56  ;;  %v374_v63 = vsel %vm373_vm14, %v2541_v16, %v372_v59 }
 0x117   : > { %v1218_v12 = vrot.slane %v1217_v5, 2  ;;  %v1219_v13 = vrot.slane %v1217_v5, 4  ;;  %v1243_v17 = vrot.slane %v1242_v6, 2  ;;  %v1244_v7 = vrot.slane %v1242_v6, 4  ;;  %v2602_v32 = vpop.permute.xlu2 %1140 }
 0x118   : > { %1369 = vrot.lane.b32.xlu2 %v1367_v61, %s2809_s16  ;;  %1208 = vrot.lane.b32.xlu1 %v1206_v8, %s2808_s5  ;;  %v391_v1 = vrot.slane %v2539_v14, 2 }
 0x119   : > { %v1221_v20 = vsel %vm1220_vm0, %v1218_v12, %v1219_v13  ;;  %v1245_v21 = vsel %vm577_vm5, %v1243_v17, %v1244_v7  ;;  %1096 = vrot.lane.b32.xlu0 %v1094_v9, %s2807_s28  ;;  %s1605_s28 = sld [smem:[#allocation4 + $0x31]] }
 0x11a   : > { %v1226_v23 = vmul.f32 %v1225_v53, %v1221_v20  ;;  %v1247_v24 = vmul.f32 %v1245_v21, %v1240_v10  ;;  %v1250_v25 = vmul.f32 %v1249_v11, %v1245_v21  ;;  %v1223_v26 = vmul.f32 %v1221_v20, %v1215_v22 }
 0x11b   : > { %v393_v6 = vsel %vm392_vm3, %v2539_v14, %v391_v1 }
 0x11c   : > { %v1726_v27 = vrot.slane %v1226_v23, 9  ;;  %v1729_v28 = vrot.slane %v1250_v25, 9  ;;  %v494_v23 = vstv %s1626_s11  ;;  %s2055_s11 = smov 45  }
 0x11d   : > { %v495_v25 = vmul.f32 %v2607_v46, %v494_v23 }
 0x11e   : > { %v1378_v29 = vpop.permute.xlu1 %1377  ;;  %v2594_v49 = vpop.permute.xlu0 %513  ;;  %v1231_v30 = vadd.f32 %v1726_v27, %v1223_v26  ;;  %v1255_v31 = vadd.f32 %v1729_v28, %v1247_v24  ;;  %v491_v26 = vstv %s1625_s22  ;;  %s1439_s22 = sld [smem:[#allocation3]] }
 0x11f   : > { %v1379_v33 = vrot.slane %v1378_v29, 2  ;;  %v1380_v34 = vrot.slane %v1378_v29, 4  ;;  %v332_v43 = vstv %s1605_s28  ;;  %v2613_v55 = vpop.permute.xlu2 %1301  ;;  %v492_v28 = vmul.f32 %v2607_v46, %v491_v26  ;;  %s2053_s28 = smov 47  }
 0x120   : > { %1233 = vrot.lane.b32.xlu1 %v1231_v30, %s2808_s5  ;;  %1418 = vrot.lane.b32.xlu2 %v1416_v15, %s2809_s16  ;;  %v333_v47 = vmul.f32 %v2607_v46, %v332_v43  ;;  %v1627_v15 = vrot.slane %v495_v25, 9  ;;  %v515_v30 = vrot.slane %v2594_v49, 2 }
 0x121   : > { %v1382_v36 = vsel %vm1381_vm6, %v1379_v33, %v1380_v34  ;;  %1257 = vrot.lane.b32.xlu0 %v1255_v31, %s2808_s5  ;;  %s1646_s5 = sld [smem:[#allocation4 + $0x2]] }
 0x122   : > { %v1387_v38 = vmul.f32 %v1386_v35, %v1382_v36  ;;  %v1384_v39 = vmul.f32 %v1382_v36, %v1376_v37  ;;  %v1606_v54 = vrot.slane %v333_v47, 9  ;;  %v500_v31 = vadd.f32 %v1627_v15, %v492_v28 }
 0x123   : > { %v516_v34 = vsel %vm354_vm11, %v2594_v49, %v515_v30  ;;  %v650_v36 = vstv %s1647_s26 }
 0x124   : > { %v1747_v40 = vrot.slane %v1387_v38, 9  ;;  %v338_v57 = vadd.f32 %v1606_v54, %v330_v52  ;;  %v518_v37 = vadd.f32 %v516_v34, %v500_v31  ;;  %v651_v43 = vmul.f32 %v2607_v46, %v650_v36 }
 0x125   : > { %v960_v34 = vstv %s2666_s24  ;;  %s2810_s24 = sshll.u32 %s2188_s15, 3 }
 0x126   : > { %v2600_v41 = vpop.permute.xlu0 %549  ;;  %v1392_v42 = vadd.f32 %v1747_v40, %v1384_v39  ;;  %v2605_v45 = vpop.permute.xlu1 %531  ;;  %v357_v62 = vadd.f32 %v355_v44, %v338_v57  ;;  %v1648_v57 = vrot.slane %v651_v43, 9  ;;  %v957_v43 = vstv %s2672_s7  ;;  %s247_s7 = scalar_lea.vmem [#allocation11], %s2810_s24 }
 0x127   : > { %v533_v35 = vrot.slane %v2605_v45, 2  ;;  %v551_v40 = vrot.slane %v2600_v41, 2  ;;  %v647_v48 = vstv %s1646_s5 }
 0x128   : > { %1394 = vrot.lane.b32.xlu1 %v1392_v42, %s2809_s16  ;;  %v376_v53 = vadd.f32 %v374_v63, %v357_v62  ;;  %v648_v56 = vmul.f32 %v2607_v46, %v647_v48  ;;  %s1731_s16 = sld [smem:[#allocation4 + $0x37]] }
 0x129   : > { %v534_v39 = vsel %vm373_vm14, %v2605_v45, %v533_v35  ;;  %v552_v49 = vsel %vm392_vm3, %v2600_v41, %v551_v40  ;;  %v671_v45 = vrot.slane %v2515_v60, 2 }
 0x12a   : > { %v395_v9 = vadd.f32 %v393_v6, %v376_v53  ;;  %v536_v52 = vadd.f32 %v534_v39, %v518_v37 }
 0x12b   : > { %v672_v6 = vsel %vm354_vm11, %v2515_v60, %v671_v45 }
 0x12c   : > { %v554_v62 = vadd.f32 %v552_v49, %v536_v52 }
 0x12e   : > { %v2610_v50 = vpop.permute.xlu0 %979  ;;  %v2616_v58 = vpop.permute.xlu1 %687 }
 0x12f   : > { %v689_v53 = vrot.slane %v2616_v58, 2 }
 0x136   : > { %v2621_v61 = vpop.permute.xlu0 %863  ;;  %v2626_v4 = vpop.permute.xlu1 %705 }
 0x13a   : > { %v417_v0 = vpop.permute.xlu2 %416 }
 0x13b   : > { %v418_v2 = vrot.slane %v417_v0, 6 }
 0x13d   : > { %v420_v51 = vsel %vm419_vm12, %v418_v2, %v417_v0  ;;  %v656_v2 = vadd.f32 %v1648_v57, %v648_v56  ;;  %v958_v56 = vmul.f32 %v2607_v46, %v957_v43 }
 0x13e   : > { %v443_v5 = vpop.permute.xlu0 %442  ;;  %v422_v11 = vadd.f32 %v420_v51, %v395_v9  ;;  %v2633_v18 = vpop.permute.xlu1 %997 }
 0x13f   : > { %v444_v8 = vrot.slane %v443_v5, 6 }
 0x141   : > { %v445_v10 = vsel %vm419_vm12, %v444_v8, %v443_v5 }
 0x142   : > { %v468_v12 = vpop.permute.xlu2 %467  ;;  %v447_v13 = vadd.f32 %v445_v10, %v422_v11  ;;  %v674_v10 = vadd.f32 %v672_v6, %v656_v2  ;;  %v690_v11 = vsel %vm373_vm14, %v2616_v58, %v689_v53 }
 0x143   : > { %v469_v16 = vrot.slane %v468_v12, 6 }
 0x145   : > { %v470_v17 = vsel %vm419_vm12, %v469_v16, %v468_v12  ;;  %v707_v12 = vrot.slane %v2626_v4, 2 }
 0x146   : > { %v472_v7 = vadd.f32 %v470_v17, %v447_v13  ;;  %v2639_v27 = vpop.permute.xlu1 %1158 }
 0x148   : > { %v474_v19 = vrot.slane %v472_v7, 1  ;;  %v475_v14 = vrot.slane %v472_v7, 2  ;;  %v476_v20 = vrot.slane %v472_v7, 3 }
 0x14a   : > { %v477_v21 = vsel %vm304_vm2, %v472_v7, %v474_v19  ;;  %v479_v22 = vsel %vm478_vm7, %v475_v14, %v476_v20  ;;  %v731_v29 = vpop.permute.xlu2 %730  ;;  %v865_v19 = vrot.slane %v2621_v61, 6 }
 0x14b   : > { %v481_v24 = vsel %vm480_vm8, %v477_v21, %v479_v22  ;;  %v732_v60 = vrot.slane %v731_v29, 6  ;;  %v692_v21 = vadd.f32 %v690_v11, %v674_v10  ;;  %v1121_v10 = vstv %s2687_s27  ;;  %s1482_s27 = scalar_lea.sflag [#allocation6], %s2188_s15 }
 0x14c   : > { %482 = vrot.lane.b32.xlu0 %v481_v24, %s2049_s8  ;;  %v708_v24 = vsel %vm392_vm3, %v2626_v4, %v707_v12  ;;  %v866_v26 = vsel %vm392_vm3, %v865_v19, %v2621_v61  ;;  %v961_v61 = vmul.f32 %v2607_v46, %v960_v34  ;;  %v1118_v19 = vstv %s2694_s12 }
 0x14d   : > { %v734_v28 = vsel %vm733_vm15, %v732_v60, %v731_v29  ;;  %v710_v30 = vadd.f32 %v708_v24, %v692_v21  ;;  %v868_v35 = vadd.f32 %v866_v26, %v2580_v3  ;;  %v1119_v21 = vmul.f32 %v2607_v46, %v1118_v19 }
 0x14e   : > { %v2646_v38 = vpop.permute.xlu1 %1319  ;;  %v1282_v24 = vstv %s1731_s16 }
 0x14f   : > { %v736_v37 = vadd.f32 %v734_v28, %v710_v30 }
 0x152   : > { %v575_v33 = vpop.permute.xlu0 %574  ;;  %v888_v42 = vpop.permute.xlu2 %887 }
 0x153   : > { %v576_v47 = vrot.slane %v575_v33, 6  ;;  %v889_v22 = vrot.slane %v888_v42, 6 }
 0x155   : > { %v578_v44 = vsel %vm577_vm5, %v576_v47, %v575_v33  ;;  %v890_v31 = vsel %vm392_vm3, %v889_v22, %v888_v42 }
 0x156   : > { %v580_v1 = vadd.f32 %v578_v44, %v554_v62  ;;  %v892_v47 = vadd.f32 %v890_v31, %v868_v35  ;;  %v1690_v44 = vrot.slane %v961_v61, 9  ;;  %v1160_v35 = vrot.slane %v2639_v27, 2 }
 0x157   : > { %v1303_v61 = vrot.slane %v2613_v55, 2 }
 0x158   : > { %v966_v11 = vadd.f32 %v1690_v44, %v958_v56 }
 0x15a   : > { %v626_v54 = vpop.permute.xlu0 %625  ;;  %v2662_v51 = vpop.permute.xlu2 %1047 }
 0x15b   : > { %v627_v59 = vrot.slane %v626_v54, 6  ;;  %v1049_v26 = vrot.slane %v2662_v51, 6 }
 0x15d   : > { %v628_v5 = vsel %vm577_vm5, %v627_v59, %v626_v54 }
 0x162   : > { %v601_v63 = vpop.permute.xlu1 %600  ;;  %v936_v15 = vpop.permute.xlu2 %935 }
 0x163   : > { %v602_v0 = vrot.slane %v601_v63, 6  ;;  %v2670_v14 = vpop.permute.xlu0 %1022  ;;  %v937_v33 = vrot.slane %v936_v15, 6 }
 0x165   : > { %v603_v41 = vsel %vm577_vm5, %v602_v0, %v601_v63  ;;  %v938_v29 = vsel %vm392_vm3, %v937_v33, %v936_v15  ;;  %v981_v63 = vrot.slane %v2610_v50, 2  ;;  %v1279_v33 = vstv %s1730_s30  ;;  %s1963_s30 = scalar_lea.hbm %s2792_s4, 16 }
 0x166   : > { %v605_v8 = vadd.f32 %v603_v41, %v580_v1 }
 0x168   : > { %v630_v9 = vadd.f32 %v628_v5, %v605_v8 }
 0x16a   : > { %v757_v16 = vpop.permute.xlu1 %756  ;;  %v632_v13 = vrot.slane %v630_v9, 1  ;;  %v633_v17 = vrot.slane %v630_v9, 2  ;;  %v634_v7 = vrot.slane %v630_v9, 3  ;;  %v1345_v28 = vpop.permute.xlu2 %1344 }
 0x16b   : > { %v758_v25 = vrot.slane %v757_v16, 6 }
 0x16c   : > { %v635_v20 = vsel %vm304_vm2, %v630_v9, %v632_v13  ;;  %v636_v58 = vsel %vm478_vm7, %v633_v17, %v634_v7  ;;  %v999_v13 = vrot.slane %v2633_v18, 2  ;;  %v1122_v17 = vmul.f32 %v2607_v46, %v1121_v10 }
 0x16d   : > { %v637_v23 = vsel %vm480_vm8, %v635_v20, %v636_v58  ;;  %v759_v36 = vsel %vm733_vm15, %v758_v25, %v757_v16  ;;  %v982_v16 = vsel %vm354_vm11, %v2610_v50, %v981_v63  ;;  %v1024_v7 = vrot.slane %v2670_v14, 6 }
 0x16e   : > { %638 = vrot.lane.b32.xlu1 %v637_v23, %s2050_s29  ;;  %v761_v42 = vadd.f32 %v759_v36, %v736_v37  ;;  %v984_v60 = vadd.f32 %v982_v16, %v966_v11  ;;  %v1000_v20 = vsel %vm373_vm14, %v2633_v18, %v999_v13  ;;  %v1711_v22 = vrot.slane %v1122_v17, 9  ;;  %s1495_s29 = sshll.u32 %s247_s7, 4  ;;  %s1496_s29 = int_to_ptr.vmem [resolvable:$true] %s1495_s29 }
 0x16f   : > { %v1025_v50 = vsel %vm768_vm4, %v1024_v7, %v2670_v14  ;;  %v1142_v23 = vrot.slane %v2602_v32, 2  ;;  %v1283_v18 = vmul.f32 %v2607_v46, %v1282_v24  ;;  %v1050_v14 = vsel %vm768_vm4, %v1049_v26, %v2662_v51 }
 0x170   : > { %v1002_v25 = vadd.f32 %v1000_v20, %v984_v60  ;;  %v1127_v31 = vadd.f32 %v1711_v22, %v1119_v21  ;;  %v1280_v37 = vmul.f32 %v2607_v46, %v1279_v33  ;;  %v1304_v46 = vsel %vm354_vm11, %v2613_v55, %v1303_v61 }
 0x171   : > { %v1143_v34 = vsel %vm354_vm11, %v2602_v32, %v1142_v23  ;;  %v1161_v32 = vsel %vm373_vm14, %v2639_v27, %v1160_v35  ;;  %vm485_vm11 = vcmask 416768  }
 0x172   : > { %v912_v4 = vpop.permute.xlu1 %911  ;;  %v1027_v30 = vadd.f32 %v1025_v50, %v1002_v25  ;;  %v1370_v44 = vpop.permute.xlu2 %1369 }
 0x173   : > { %v913_v39 = vrot.slane %v912_v4, 6  ;;  %v782_v40 = vpop.permute.xlu0 %781  ;;  %v1371_v11 = vrot.slane %v1370_v44, 6 }
 0x174   : > { %v783_v48 = vrot.slane %v782_v40, 6 }
 0x175   : > { %v914_v52 = vsel %vm392_vm3, %v913_v39, %v912_v4  ;;  %v1372_v20 = vsel %vm454_vm10, %v1371_v11, %v1370_v44  ;;  %vm1273_vm3 = vcmask 375808   ;;  %v1461_v11 = vld [vmem:[%s2194_s25] sm:$0xff]  ;;  %s1758_s25 = sshll.u32 %s2105_s1, 3 }
 0x176   : > { %v916_v49 = vadd.f32 %v914_v52, %v892_v47  ;;  %v784_v3 = vsel %vm733_vm15, %v783_v48, %v782_v40  ;;  %v1052_v40 = vadd.f32 %v1050_v14, %v1027_v30  ;;  %v1145_v47 = vadd.f32 %v1143_v34, %v1127_v31  ;;  %1468 = vst [vmem:[#allocation1] ss:$2 sm:$0xff] %v1461_v11  ;;  %s1493_s5 = scalar_lea.hbm %s2792_s4, %s1758_s25 }
 0x177   : > { %v786_v54 = vadd.f32 %v784_v3, %v761_v42  ;;  %v1732_v48 = vrot.slane %v1283_v18, 9  ;;  %s1497_s1 = sshll.u32 %s1493_s5, 4  ;;  %s1498_s1 = int_to_ptr.hbm [resolvable:$true] %s1497_s1 }
 0x178   : > { %v940_v57 = vadd.f32 %v938_v29, %v916_v49  ;;  %v1163_v56 = vadd.f32 %v1161_v32, %v1145_v47  ;;  %s1957_s12 = sshra.s32 %s1498_s1, 4  ;;  %s1958_s12 = int_to_ptr.hbm [resolvable:$true] %s1957_s12 }
 0x179   : > { %v788_v59 = vrot.slane %v786_v54, 1  ;;  %v789_v45 = vrot.slane %v786_v54, 2  ;;  %v790_v62 = vrot.slane %v786_v54, 3  ;;  %s1959_s16 = scalar_lea.hbm %s1958_s12, 8  ;;  %p1964_p9 = scmp.lt.s32.totalorder %s1958_s12, %s2792_s4 }
 0x17a   : > { %v942_v0 = vrot.slane %v940_v57, 1  ;;  %v943_v1 = vrot.slane %v940_v57, 2  ;;  %v944_v2 = vrot.slane %v940_v57, 3  ;;  %v1419_v19 = vpop.permute.xlu2 %1418  ;;  %p1960_p1 = scmp.ne.s32.totalorder %s1958_s12, %s1959_s16  ;;  %p1965_p10 = scmp.lt.s32.totalorder %s1963_s30, %s1959_s16 }
 0x17b   : > { %v1184_v53 = vpop.permute.xlu0 %1183  ;;  %v791_v5 = vsel %vm304_vm2, %v786_v54, %v788_v59  ;;  %v792_v41 = vsel %vm478_vm7, %v789_v45, %v790_v62  ;;  %v1288_v54 = vadd.f32 %v1732_v48, %v1280_v37  ;;  %v1420_v23 = vrot.slane %v1419_v19, 6 }
 0x17c   : > { %v793_v6 = vsel %vm480_vm8, %v791_v5, %v792_v41  ;;  %v945_v8 = vsel %vm304_vm2, %v940_v57, %v942_v0  ;;  %v946_v9 = vsel %vm478_vm7, %v943_v1, %v944_v2  ;;  %v1185_v39 = vrot.slane %v1184_v53, 6  ;;  %p1961_p4 = pnand %p1960_p1, %p2153_p5  ;;  %p1966_p2 = por %p1965_p10, %p1964_p9 }
 0x17d   : > { %794 = vrot.lane.b32.xlu2 %v793_v6, %s2051_s9  ;;  %v947_v12 = vsel %vm480_vm8, %v945_v8, %v946_v9  ;;  %v1321_v57 = vrot.slane %v2646_v38, 2  ;;  %v1346_v1 = vrot.slane %v1345_v28, 6  ;;  %v1306_v6 = vadd.f32 %v1304_v46, %v1288_v54 }
 0x17e   : > { %948 = vrot.lane.b32.xlu0 %v947_v12, %s2052_s21  ;;  %v1186_v49 = vsel %vm612_vm9, %v1185_v39, %v1184_v53  ;;  %v1421_v33 = vsel %vm454_vm10, %v1420_v23, %v1419_v19  ;;  %p1962_p8 = pneg %p1961_p4 }
 0x17f   : > { %v1188_v63 = vadd.f32 %v1186_v49, %v1163_v56  ;;  %v1322_v10 = vsel %vm373_vm14, %v2646_v38, %v1321_v57  ;;  %v1347_v17 = vsel %vm454_vm10, %v1346_v1, %v1345_v28  ;;  %vm1112_vm14 = vcmask 384000   ;;  %v323_v57 = vld [vmem:[#allocation8 + $0x4] sm:$0x3] }
 0x180   : > { %v1324_v7 = vadd.f32 %v1322_v10, %v1306_v6  ;;  %p1967_p11 = pnand %p1966_p2, %p1962_p8 }
 0x183   : > { %v1073_v58 = vpop.permute.xlu0 %1072 }
 0x184   : > { %v1074_v15 = vrot.slane %v1073_v58, 6 }
 0x186   : > { %v1075_v36 = vsel %vm768_vm4, %v1074_v15, %v1073_v58  ;;  %v1349_v58 = vadd.f32 %v1347_v17, %v1324_v7 }
 0x187   : > { %v1077_v42 = vadd.f32 %v1075_v36, %v1052_v40 }
 0x188   : > { %v1374_v25 = vadd.f32 %v1372_v20, %v1349_v58 }
 0x18a   : > { %v1209_v4 = vpop.permute.xlu1 %1208 }
 0x18b   : > { %v1097_v43 = vpop.permute.xlu0 %1096  ;;  %v1210_v52 = vrot.slane %v1209_v4, 6 }
 0x18c   : > { %v1098_v29 = vrot.slane %v1097_v43, 6 }
 0x18d   : > { %v1211_v59 = vsel %vm612_vm9, %v1210_v52, %v1209_v4  ;;  %v321_v52 = vld [vmem:[#allocation8] sm:$0x3] }
 0x18e   : > { %v1099_v51 = vsel %vm768_vm4, %v1098_v29, %v1097_v43  ;;  %v1213_v55 = vadd.f32 %v1211_v59, %v1188_v63  ;;  %v322_v29 = vld [vmem:[#allocation8 + $0x2] sm:$0x3]  ;;  %v324_v59 = vld [vmem:[#allocation8 + $0x6] sm:$0x3]  ;;  %v325_v63 = vld [vmem:[#allocation8 + $0x8] sm:$0x3] }
 0x18f   : > { %v1101_v3 = vadd.f32 %v1099_v51, %v1077_v42  ;;  %vm1434_vm4 = vcmask 367616  }
 0x191   : > { %v1103_v45 = vrot.slane %v1101_v3, 1  ;;  %v1104_v62 = vrot.slane %v1101_v3, 2  ;;  %v1105_v27 = vrot.slane %v1101_v3, 3 }
 0x192   : > { %v1234_v0 = vpop.permute.xlu1 %1233 }
 0x193   : > { %v1235_v2 = vrot.slane %v1234_v0, 6  ;;  %v1106_v53 = vsel %vm304_vm2, %v1101_v3, %v1103_v45  ;;  %v1107_v5 = vsel %vm478_vm7, %v1104_v62, %v1105_v27  ;;  %v1258_v41 = vpop.permute.xlu0 %1257 }
 0x194   : > { %v1108_v8 = vsel %vm480_vm8, %v1106_v53, %v1107_v5  ;;  %v1259_v9 = vrot.slane %v1258_v41, 6 }
 0x195   : > { %v1236_v12 = vsel %vm612_vm9, %v1235_v2, %v1234_v0  ;;  %1109 = vrot.lane.b32.xlu1 %v1108_v8, %s2053_s28 }
 0x196   : > { %v1238_v16 = vadd.f32 %v1236_v12, %v1213_v55  ;;  %v1260_v13 = vsel %vm612_vm9, %v1259_v9, %v1258_v41  ;;  %vm641_vm9 = vcmask 408576   ;;  %v326_v55 = vld [vmem:[#allocation8 + $0xa] sm:$0x3]  ;;  %v327_v12 = vld [vmem:[#allocation8 + $0xc] sm:$0x3] }
 0x198   : > { %v1262_v60 = vadd.f32 %v1260_v13, %v1238_v16 }
 0x19a   : > { %v1395_v21 = vpop.permute.xlu1 %1394  ;;  %v1264_v22 = vrot.slane %v1262_v60, 1  ;;  %v1265_v50 = vrot.slane %v1262_v60, 2  ;;  %v1266_v38 = vrot.slane %v1262_v60, 3 }
 0x19b   : > { %v1396_v24 = vrot.slane %v1395_v21, 6 }
 0x19c   : > { %v1267_v26 = vsel %vm304_vm2, %v1262_v60, %v1264_v22  ;;  %v1268_v15 = vsel %vm478_vm7, %v1265_v50, %v1266_v38  ;;  %v1440_v60 = vstv %s1439_s22 }
 0x19d   : > { %v1397_v30 = vsel %vm454_vm10, %v1396_v24, %v1395_v21  ;;  %v1269_v28 = vsel %vm480_vm8, %v1267_v26, %v1268_v15  ;;  %vm951_vm10 = vcmask 392192  }
 0x19e   : > { %v1399_v31 = vadd.f32 %v1397_v30, %v1374_v25  ;;  %1270 = vrot.lane.b32.xlu2 %v1269_v28, %s2054_s6 }
 0x1a0   : > { %v1423_v18 = vadd.f32 %v1421_v33, %v1399_v31 }
 0x1a2   : > { %v1425_v34 = vrot.slane %v1423_v18, 1  ;;  %v1426_v35 = vrot.slane %v1423_v18, 2  ;;  %v1427_v14 = vrot.slane %v1423_v18, 3 }
 0x1a4   : > { %v1428_v36 = vsel %vm304_vm2, %v1423_v18, %v1425_v34  ;;  %v1429_v4 = vsel %vm478_vm7, %v1426_v35, %v1427_v14  ;;  %vm797_vm2 = vcmask 400384   ;;  %v1470_v18 = vld.sshfl [vmem:[#allocation1 + $0x8] sm:$0xff pattern:$0x75316420] }
 0x1a5   : > { %v1430_v37 = vsel %vm480_vm8, %v1428_v36, %v1429_v4  ;;  %v1469_v14 = vld.sshfl [vmem:[#allocation1] sm:$0xff pattern:$0x75316420] }
 0x1a6   : > { %1431 = vrot.lane.b32.xlu0 %v1430_v37, %s2055_s11 }
 0x1be   : > { %v483_v39 = vpop.permute.xlu0 %482 }
 0x1bf   : > { %v484_v47 = vrot.slane %v483_v39, 1 }
 0x1c1   : > { %v486_v51 = vsel %vm485_vm11, %v483_v39, %v484_v47 }
 0x1c2   : > { %v488_v56 = vmul.f32 %v486_v51, %v321_v52 }
 0x1d7   : > { %v795_v48 = vpop.permute.xlu2 %794 }
 0x1d8   : > { %v796_v49 = vrot.slane %v795_v48, 1 }
 0x1da   : > { %v798_v44 = vsel %vm797_vm2, %v795_v48, %v796_v49 }
 0x1db   : > { %v800_v1 = vmul.f32 %v798_v44, %v323_v57 }
 0x1e0   : > { %v639_v40 = vpop.permute.xlu1 %638 }
 0x1e1   : > { %v640_v43 = vrot.slane %v639_v40, 1 }
 0x1e3   : > { %v642_v32 = vsel %vm641_vm9, %v639_v40, %v640_v43 }
 0x1e4   : > { %v644_v54 = vmul.f32 %v642_v32, %v322_v29 }
 0x1e6   : > { %v645_v62 = vadd.f32 %v644_v54, %v488_v56 }
 0x1e8   : > { %v801_v5 = vadd.f32 %v800_v1, %v645_v62 }
 0x1f0   : > { %v949_v61 = vpop.permute.xlu0 %948 }
 0x1f1   : > { %v950_v3 = vrot.slane %v949_v61, 1 }
 0x1f3   : > { %v952_v45 = vsel %vm951_vm10, %v949_v61, %v950_v3 }
 0x1f4   : > { %v954_v2 = vmul.f32 %v952_v45, %v324_v59 }
 0x1f6   : > { %v955_v6 = vadd.f32 %v954_v2, %v801_v5 }
 0x1f8   : > { %v1271_v27 = vpop.permute.xlu2 %1270 }
 0x1f9   : > { %v1272_v53 = vrot.slane %v1271_v27, 1 }
 0x1fb   : > { %v1274_v8 = vsel %vm1273_vm3, %v1271_v27, %v1272_v53 }
 0x1fc   : > { %v1276_v13 = vmul.f32 %v1274_v8, %v326_v55 }
 0x207   : > { %v1110_v42 = vpop.permute.xlu1 %1109 }
 0x208   : > { %v1111_v46 = vrot.slane %v1110_v42, 1 }
 0x20a   : > { %v1113_v0 = vsel %vm1112_vm14, %v1110_v42, %v1111_v46 }
 0x20b   : > { %v1115_v41 = vmul.f32 %v1113_v0, %v325_v63 }
 0x20d   : > { %v1116_v9 = vadd.f32 %v1115_v41, %v955_v6 }
 0x20f   : > { %v1277_v7 = vadd.f32 %v1276_v13, %v1116_v9 }
 0x218   : > { %v1432_v10 = vpop.permute.xlu0 %1431 }
 0x219   : > { %v1433_v16 = vrot.slane %v1432_v10, 1 }
 0x21b   : > { %v1435_v17 = vsel %vm1434_vm4, %v1432_v10, %v1433_v16 }
 0x21c   : > { %v1437_v19 = vmul.f32 %v1435_v17, %v327_v12 }
 0x21e   : > { %v1438_v20 = vadd.f32 %v1437_v19, %v1277_v7 }
 0x220   : > { %v1441_v58 = vadd.f32 %v1440_v60, %v1438_v20 }
 0x222   : > { %v1751_v21 = vmul.f32 -1.442695, %v1441_v58 }
 0x224   : > { %1863 = vpow2.f32 %v1751_v21 }
 0x22a   : > { %v1864_v22 = vpop.eup %1863 }
 0x22b   : > { %v1445_v50 = vadd.f32 1.0, %v1864_v22 }
 0x22d   : > { %1865 = vrcp.f32 %v1445_v50  ;;  %v1457_v25 = vand.u32 2147483648, %v1445_v50  ;;  %v1455_v15 = vand.u32 2147483647, %v1445_v50  ;;  %vm1451_vm13 = vweird.f32 %v1445_v50 }
 0x22f   : > { %v1458_v28 = vor.u32 1.1754944e-38, %v1457_v25  ;;  %vm1456_vm0 = vcmp.eq.f32.partialorder %v1455_v15, 8.507059e+37 }
 0x233   : > { %v1866_v38 = vpop.eup %1865 }
 0x234   : > { %v1447_v23 = vmul.f32 %v1866_v38, %v1445_v50  ;;  %vm1452_vm12 = vweird.f32 %v1866_v38 }
 0x235   : > { %vm1453_vm15 = vmor %vm1451_vm13, %vm1452_vm12 }
 0x236   : > { %v1448_v24 = vsub.f32 1.0, %v1447_v23 }
 0x238   : > { %v1449_v26 = vmul.f32 %v1866_v38, %v1448_v24 }
 0x23a   : > { %v1450_v30 = vadd.f32 %v1866_v38, %v1449_v26 }
 0x23c   : > { %v1454_v31 = vsel %vm1453_vm15, %v1866_v38, %v1450_v30 }
 0x23d   : > { %v1459_v33 = vsel %vm1456_vm0, %v1458_v28, %v1454_v31 }
 0x23e   : > { %v1463_v34 = vperm.slane %v1459_v33, 0  ;;  %v1464_v35 = vperm.slane %v1459_v33, 1 }
 0x240   : > { %v1474_v36 = vmul.f32 %v1470_v18, %v1464_v35  ;;  %v1473_v4 = vmul.f32 %v1469_v14, %v1463_v34 }
 0x242   : > { %v1477_v37 = vrot.slane %v1474_v36, 4 }
 0x244   : > { %v1478_v39 = vsel %vm255_vm1, %v1473_v4, %v1477_v37 }
 0x245   : > { %1480 = vst [vmem:[%s247_s7] sm:$0xff] %v1478_v39 }
 0x246   : > { %1970 = shalt.err (!%p1967_p11)
}
 0x247   : > { %1769 = dma.vmem_to_hbm [thread:$0]  (%p2153_p5), %s1496_s29, 128, %s1498_s1, %s1482_s27  }
 0x248 PF: > { %s1509_s15 = sand.u32 1, %s2005_s17   ;;  %p2811_p12 = scmp.ge.s32.totalorder %s2017_s20, 2 }
 0x249   : > { %s1510_s11 = scalar_lea.sflag [#allocation6], %s1509_s15 }
 0x24a   : > { %p1783_p13 = pnand %p2811_p12, %p2119_p6 }
 0x24c   : > { %p1784_p0 = pneg %p1783_p13 }
 0x24e   : > { %2000 = dma.done.wait (%p1784_p0), %s1510_s11, 128  }
 0x24f   : > { %2002 = vsyncadd (%p1784_p0), %s1510_s11, 4294967168  ;;  %p20_p3 = scmp.ge.s32.totalorder %s2140_s10, 4   ;;  %s2812_s17 = smov %s2009_s18 }
 0x250   : > { %s2813_s18 = smov %s2013_s19  ;;  %s2814_s19 = smov %s2149_s13 }
 0x251   : > { %s2815_s20 = smov %s2140_s10  ;;  %22 = sbr.rel (!%p20_p3) target bundleno = 9 (0x9), region = 93 }
 0x256   :  { %1516 = vsyncpa [#allocation5], 1 }
 0x257   :  { %1518 = vsyncpa [#allocation5 + $0x1], 1 }
 0x258   :  { %1519 = vsyncpa [#allocation10], 1 }
 0x259   :  { %1521 = vsyncpa [#allocation10 + $0x1], 1 }
 0x25a   :  { %1522 = vsyncpa [#allocation6], 1 }
 0x25b   :  { %1524 = vsyncpa [#allocation6 + $0x1], 1 }
 0x25c   :  { %1525 = vsyncpa [#allocation7], 1 }
 0x25d   :  { %1527 = vsyncpa [#allocation7 + $0x1], 1 }

</bundles_post_ra>
